<compile_context>
chip_gen: v7x
topology: tpu7x:2x2x1
jax: 0.10.0
libtpu: 0.0.40
codegen_flags: <defaults>
</compile_context>

<pallas_src>
import functools
import math

import jax
import jax.numpy as jnp
from jax import lax
from jax.experimental import pallas as pl
from jax.experimental.pallas import tpu as pltpu


def lstm_ffn_kernel(x_ref, wih_ref, whh_ref, blstm_ref,
                    w1_ref, b1_ref, w2_ref, b2_ref,
                    out_ref, xg_scr, hs_scr, *, T, Bp):
    Hp = whh_ref.shape[0]          # padded hidden size (multiple of 128)

    # (1) Batched input projection over all T*Bp rows: one big MXU matmul,
    #     hoisted off the recurrence and parked in VMEM scratch.
    xg_scr[...] = (jnp.dot(x_ref[...], wih_ref[...],
                           preferred_element_type=jnp.float32)
                   + blstm_ref[...])                              # (T*Bp, 4Hp)

    whh = whh_ref[...]             # hoisted load of the recurrent weights

    # (2) Sequential recurrence: h_prev @ W_hh + elementwise per step.
    #     Each gate occupies an aligned 128-lane block, so every slice below is
    #     a full (Bp, Hp) vreg tile with no cross-lane shuffles.
    def step(t, carry):
        h, c = carry
        row = pl.multiple_of(t * Bp, 8)
        gates = (xg_scr[pl.ds(row, Bp), :]
                 + jnp.dot(h, whh, preferred_element_type=jnp.float32))
        i_g = jax.nn.sigmoid(gates[:, 0 * Hp:1 * Hp])
        f_g = jax.nn.sigmoid(gates[:, 1 * Hp:2 * Hp])
        g_g = jnp.tanh(gates[:, 2 * Hp:3 * Hp])
        o_g = jax.nn.sigmoid(gates[:, 3 * Hp:4 * Hp])
        c = f_g * c + i_g * g_g
        h = o_g * jnp.tanh(c)
        hs_scr[pl.ds(row, Bp), :] = h          # (8, 128k): unmasked vst
        return (h, c)

    h0 = jnp.zeros((Bp, Hp), jnp.float32)
    c0 = jnp.zeros((Bp, Hp), jnp.float32)
    lax.fori_loop(0, T, step, (h0, c0), unroll=True)

    # (3) FFN head batched over all T*Bp rows: Linear -> exact GELU -> Linear,
    #     single lane-dense (multiple-of-128-wide) output store.
    hs = hs_scr[...]                                              # (T*Bp, Hp)
    z1 = jnp.dot(hs, w1_ref[...], preferred_element_type=jnp.float32) + b1_ref[...]
    inv_sqrt2 = jnp.float32(1.0 / math.sqrt(2.0))
    a1 = 0.5 * z1 * (1.0 + lax.erf(z1 * inv_sqrt2))               # exact GELU
    out_ref[...] = (jnp.dot(a1, w2_ref[...], preferred_element_type=jnp.float32)
                    + b2_ref[...])


# ---------------------------------------------------------------------------
# Wrapper: layout plumbing (transpose / bias-fold / zero-padding) lives here.
# ---------------------------------------------------------------------------

def _round_up(n, m):
    return ((n + m - 1) // m) * m


def _pad_axis(a, target, axis):
    pad = target - a.shape[axis]
    if pad <= 0:
        return a
    cfg = [(0, 0)] * a.ndim
    cfg[axis] = (0, pad)
    return jnp.pad(a, cfg)


def _pad_gate_axis(a, H, Hp, axis):
    """Split a 4H-sized axis into per-gate blocks and zero-pad each to Hp."""
    blocks = jnp.split(a, 4, axis=axis)
    return jnp.concatenate([_pad_axis(b, Hp, axis) for b in blocks], axis=axis)


def lstm_model_forward(x, params):
    """x: (T, B, input_size) float32 -> (T, B, output_size) float32."""
    T, B, Din = x.shape
    w_ih, w_hh, b_ih, b_hh = params["w_ih"], params["w_hh"], params["b_ih"], params["b_hh"]
    w1, b1, w2, b2 = params["w1"], params["b1"], params["w2"], params["b2"]
    H = w_hh.shape[1]
    F = w1.shape[0]
    O = w2.shape[0]

    Bp = _round_up(B, 8)       # sublane-dense batch
    Dp = _round_up(Din, 128)   # lane-dense input features
    Hp = _round_up(H, 128)     # lane-dense hidden (per-gate block width)
    Fp = _round_up(F, 128)     # lane-dense FFN width
    Op = _round_up(O, 128)     # lane-dense output store

    f32 = jnp.float32

    # Input: pad batch + feature dims with zeros, flatten time into rows.
    x_p = jnp.zeros((T, Bp, Dp), f32).at[:, :B, :Din].set(jnp.asarray(x, f32))
    x_flat = x_p.reshape(T * Bp, Dp)                                  # (T*Bp, Dp)

    # LSTM weights: transpose to (in, out), re-layout so each gate owns an
    # aligned Hp-lane block, zero-pad the contraction dims.
    wih_t = _pad_gate_axis(jnp.asarray(w_ih.T, f32), H, Hp, axis=1)   # (Din, 4Hp)
    wih_t = _pad_axis(wih_t, Dp, axis=0)                              # (Dp,  4Hp)
    whh_t = _pad_gate_axis(jnp.asarray(w_hh.T, f32), H, Hp, axis=1)   # (H,   4Hp)
    whh_t = _pad_axis(whh_t, Hp, axis=0)                              # (Hp,  4Hp)
    blstm = _pad_gate_axis(jnp.asarray((b_ih + b_hh)[None, :], f32),
                           H, Hp, axis=1)                             # (1,   4Hp)

    # FFN weights: transpose to (in, out), zero-pad both dims.
    w1_t = _pad_axis(_pad_axis(jnp.asarray(w1.T, f32), Hp, 0), Fp, 1)  # (Hp, Fp)
    b1_r = _pad_axis(jnp.asarray(b1[None, :], f32), Fp, 1)             # (1,  Fp)
    w2_t = _pad_axis(_pad_axis(jnp.asarray(w2.T, f32), Fp, 0), Op, 1)  # (Fp, Op)
    b2_r = _pad_axis(jnp.asarray(b2[None, :], f32), Op, 1)             # (1,  Op)

    vmem = pl.BlockSpec(memory_space=pltpu.MemorySpace.VMEM)

    out_flat = pl.pallas_call(
        functools.partial(lstm_ffn_kernel, T=T, Bp=Bp),
        out_shape=jax.ShapeDtypeStruct((T * Bp, Op), jnp.float32),
        in_specs=[vmem] * 8,
        out_specs=vmem,
        scratch_shapes=[pltpu.VMEM((T * Bp, 4 * Hp), jnp.float32),   # x @ W_ih
                        pltpu.VMEM((T * Bp, Hp), jnp.float32)],      # h_t slab
    )(x_flat, wih_t, whh_t, blstm, w1_t, b1_r, w2_t, b2_r)

    # Strip the padding outside the kernel.
    return out_flat.reshape(T, Bp, Op)[:, :B, :O]


# ---------------------------------------------------------------------------
# Pure-JAX reference (PyTorch LSTMModel.forward semantics) + smoke test.
# ---------------------------------------------------------------------------

def lstm_model_reference(x, params):
    w_ih, w_hh = params["w_ih"], params["w_hh"]
    b = params["b_ih"] + params["b_hh"]
    H = w_hh.shape[1]
    B = x.shape[1]

    def step(carry, x_t):
        h, c = carry
        gates = x_t @ w_ih.T + h @ w_hh.T + b
        i = jax.nn.sigmoid(gates[:, 0 * H:1 * H])
        f = jax.nn.sigmoid(gates[:, 1 * H:2 * H])
        g = jnp.tanh(gates[:, 2 * H:3 * H])
        o = jax.nn.sigmoid(gates[:, 3 * H:4 * H])
        c = f * c + i * g
        h = o * jnp.tanh(c)
        return (h, c), h

    h0 = jnp.zeros((B, H), jnp.float32)
    c0 = jnp.zeros((B, H), jnp.float32)
    _, hs = jax.lax.scan(step, (h0, c0), x)               # (T, B, H)
    z1 = hs @ params["w1"].T + params["b1"]
    a1 = jax.nn.gelu(z1, approximate=False)
    return a1 @ params["w2"].T + params["b2"]


def init_params(key, input_size, lstm_size, fnn_size, output_size):
    ks = jax.random.split(key, 8)
    s = 0.1
    return {
        "w_ih": s * jax.random.normal(ks[0], (4 * lstm_size, input_size), jnp.float32),
        "w_hh": s * jax.random.normal(ks[1], (4 * lstm_size, lstm_size), jnp.float32),
        "b_ih": s * jax.random.normal(ks[2], (4 * lstm_size,), jnp.float32),
        "b_hh": s * jax.random.normal(ks[3], (4 * lstm_size,), jnp.float32),
        "w1": s * jax.random.normal(ks[4], (fnn_size, lstm_size), jnp.float32),
        "b1": s * jax.random.normal(ks[5], (fnn_size,), jnp.float32),
        "w2": s * jax.random.normal(ks[6], (output_size, fnn_size), jnp.float32),
        "b2": s * jax.random.normal(ks[7], (output_size,), jnp.float32),
    }


if __name__ == "__main__":
    seq_len, batch = 8, 4
    input_size, lstm_size, fnn_size, output_size = 16, 32, 64, 8

    key = jax.random.PRNGKey(0)
    k_x, k_p = jax.random.split(key)
    x = jax.random.normal(k_x, (seq_len, batch, input_size), jnp.float32)
    params = init_params(k_p, input_size, lstm_size, fnn_size, output_size)

    out = lstm_model_forward(x, params)
    out = jax.block_until_ready(out)

    ref = jax.block_until_ready(lstm_model_reference(x, params))
    assert out.shape == (seq_len, batch, output_size)
    assert jnp.allclose(out, ref, rtol=1e-4, atol=1e-4), (
        f"max abs diff {jnp.max(jnp.abs(out - ref))}")

    print("KERNEL_OK")
</pallas_src>

<mosaic_0001>
module attributes {stable_mosaic.version = 11 : i64} {
  func.func @lstm_ffn_kernel(%arg0: memref<64x128xf32, #tpu.memory_space<vmem>>, %arg1: memref<128x512xf32, #tpu.memory_space<vmem>>, %arg2: memref<128x512xf32, #tpu.memory_space<vmem>>, %arg3: memref<1x512xf32, #tpu.memory_space<vmem>>, %arg4: memref<128x128xf32, #tpu.memory_space<vmem>>, %arg5: memref<1x128xf32, #tpu.memory_space<vmem>>, %arg6: memref<128x128xf32, #tpu.memory_space<vmem>>, %arg7: memref<1x128xf32, #tpu.memory_space<vmem>>, %arg8: memref<64x128xf32, #tpu.memory_space<vmem>>, %arg9: memref<64x512xf32, #tpu.memory_space<vmem>>, %arg10: memref<64x128xf32, #tpu.memory_space<vmem>>) attributes {dimension_semantics = [], scalar_prefetch = 0 : i64, scratch_operands = 2 : i64, tpu.core_type = #tpu.core_type<tc>} {
    %c0 = arith.constant 0 : index
    %c0_0 = arith.constant 0 : index
    %0 = vector.load %arg0[%c0, %c0_0] : memref<64x128xf32, #tpu.memory_space<vmem>>, vector<64x128xf32>
    %c0_1 = arith.constant 0 : index
    %c0_2 = arith.constant 0 : index
    %1 = vector.load %arg1[%c0_1, %c0_2] : memref<128x512xf32, #tpu.memory_space<vmem>>, vector<128x512xf32>
    %cst = arith.constant dense<0.000000e+00> : vector<64x512xf32>
    %2 = tpu.matmul %0, %1, %cst {dimension_numbers = #tpu.dot_dimension_numbers<[1], [0], [0], [1], [0, 0, 1, 1], [], []>} : vector<64x128xf32>, vector<128x512xf32>, vector<64x512xf32> -> vector<64x512xf32>
    %c0_3 = arith.constant 0 : index
    %c0_4 = arith.constant 0 : index
    %3 = vector.load %arg3[%c0_3, %c0_4] : memref<1x512xf32, #tpu.memory_space<vmem>>, vector<1x512xf32>
    %4 = vector.broadcast %3 : vector<1x512xf32> to vector<64x512xf32>
    %5 = arith.addf %2, %4 : vector<64x512xf32>
    %c0_5 = arith.constant 0 : index
    %c0_6 = arith.constant 0 : index
    %6 = vector.load %arg9[%c0_5, %c0_6] : memref<64x512xf32, #tpu.memory_space<vmem>>, vector<64x512xf32>
    tpu.vector_store %arg9[%c0_5, %c0_6], %5 {strides = array<i32>} : memref<64x512xf32, #tpu.memory_space<vmem>>, vector<64x512xf32>,
    %c0_7 = arith.constant 0 : index
    %c0_8 = arith.constant 0 : index
    %7 = vector.load %arg2[%c0_7, %c0_8] : memref<128x512xf32, #tpu.memory_space<vmem>>, vector<128x512xf32>
    %cst_9 = arith.constant 0.000000e+00 : f32
    %8 = vector.broadcast %cst_9 : f32 to vector<8x128xf32>
    %cst_10 = arith.constant 0.000000e+00 : f32
    %9 = vector.broadcast %cst_10 : f32 to vector<8x128xf32>
    %c0_i32 = arith.constant 0 : i32
    %c8_i32 = arith.constant 8 : i32
    %10 = arith.muli %c0_i32, %c8_i32 : i32
    %11 = tpu.assume_multiple %10, 8 : i32
    %12 = arith.index_cast %11 : i32 to index
    %c0_11 = arith.constant 0 : index
    %13 = vector.load %arg9[%12, %c0_11] : memref<64x512xf32, #tpu.memory_space<vmem>>, vector<8x512xf32>
    %cst_12 = arith.constant dense<0.000000e+00> : vector<8x512xf32>
    %14 = tpu.matmul %8, %7, %cst_12 {dimension_numbers = #tpu.dot_dimension_numbers<[1], [0], [0], [1], [0, 0, 1, 1], [], []>} : vector<8x128xf32>, vector<128x512xf32>, vector<8x512xf32> -> vector<8x512xf32>
    %15 = arith.addf %13, %14 : vector<8x512xf32>
    %16 = vector.extract_strided_slice %15 {offsets = [0, 0], sizes = [8, 128], strides = [1, 1]} : vector<8x512xf32> to vector<8x128xf32>
    %17 = arith.negf %16 : vector<8x128xf32>
    %18 = math.exp %17 : vector<8x128xf32>
    %cst_13 = arith.constant 1.000000e+00 : f32
    %19 = vector.broadcast %cst_13 : f32 to vector<8x128xf32>
    %20 = arith.addf %19, %18 : vector<8x128xf32>
    %21 = arith.divf %19, %20 : vector<8x128xf32>
    %22 = vector.extract_strided_slice %15 {offsets = [0, 128], sizes = [8, 128], strides = [1, 1]} : vector<8x512xf32> to vector<8x128xf32>
    %23 = arith.negf %22 : vector<8x128xf32>
    %24 = math.exp %23 : vector<8x128xf32>
    %cst_14 = arith.constant 1.000000e+00 : f32
    %25 = vector.broadcast %cst_14 : f32 to vector<8x128xf32>
    %26 = arith.addf %25, %24 : vector<8x128xf32>
    %27 = arith.divf %25, %26 : vector<8x128xf32>
    %28 = vector.extract_strided_slice %15 {offsets = [0, 256], sizes = [8, 128], strides = [1, 1]} : vector<8x512xf32> to vector<8x128xf32>
    %29 = math.tanh %28 : vector<8x128xf32>
    %30 = vector.extract_strided_slice %15 {offsets = [0, 384], sizes = [8, 128], strides = [1, 1]} : vector<8x512xf32> to vector<8x128xf32>
    %31 = arith.negf %30 : vector<8x128xf32>
    %32 = math.exp %31 : vector<8x128xf32>
    %cst_15 = arith.constant 1.000000e+00 : f32
    %33 = vector.broadcast %cst_15 : f32 to vector<8x128xf32>
    %34 = arith.addf %33, %32 : vector<8x128xf32>
    %35 = arith.divf %33, %34 : vector<8x128xf32>
    %36 = arith.mulf %27, %9 : vector<8x128xf32>
    %37 = arith.mulf %21, %29 : vector<8x128xf32>
    %38 = arith.addf %36, %37 : vector<8x128xf32>
    %39 = math.tanh %38 : vector<8x128xf32>
    %40 = arith.mulf %35, %39 : vector<8x128xf32>
    %41 = arith.index_cast %11 : i32 to index
    %c0_16 = arith.constant 0 : index
    %42 = vector.load %arg10[%41, %c0_16] : memref<64x128xf32, #tpu.memory_space<vmem>>, vector<8x128xf32>
    tpu.vector_store %arg10[%41, %c0_16], %40 {strides = array<i32>} : memref<64x128xf32, #tpu.memory_space<vmem>>, vector<8x128xf32>,
    %c1_i32 = arith.constant 1 : i32
    %c8_i32_17 = arith.constant 8 : i32
    %43 = arith.muli %c1_i32, %c8_i32_17 : i32
    %44 = tpu.assume_multiple %43, 8 : i32
    %45 = arith.index_cast %44 : i32 to index
    %c0_18 = arith.constant 0 : index
    %46 = vector.load %arg9[%45, %c0_18] : memref<64x512xf32, #tpu.memory_space<vmem>>, vector<8x512xf32>
    %cst_19 = arith.constant dense<0.000000e+00> : vector<8x512xf32>
    %47 = tpu.matmul %40, %7, %cst_19 {dimension_numbers = #tpu.dot_dimension_numbers<[1], [0], [0], [1], [0, 0, 1, 1], [], []>} : vector<8x128xf32>, vector<128x512xf32>, vector<8x512xf32> -> vector<8x512xf32>
    %48 = arith.addf %46, %47 : vector<8x512xf32>
    %49 = vector.extract_strided_slice %48 {offsets = [0, 0], sizes = [8, 128], strides = [1, 1]} : vector<8x512xf32> to vector<8x128xf32>
    %50 = arith.negf %49 : vector<8x128xf32>
    %51 = math.exp %50 : vector<8x128xf32>
    %cst_20 = arith.constant 1.000000e+00 : f32
    %52 = vector.broadcast %cst_20 : f32 to vector<8x128xf32>
    %53 = arith.addf %52, %51 : vector<8x128xf32>
    %54 = arith.divf %52, %53 : vector<8x128xf32>
    %55 = vector.extract_strided_slice %48 {offsets = [0, 128], sizes = [8, 128], strides = [1, 1]} : vector<8x512xf32> to vector<8x128xf32>
    %56 = arith.negf %55 : vector<8x128xf32>
    %57 = math.exp %56 : vector<8x128xf32>
    %cst_21 = arith.constant 1.000000e+00 : f32
    %58 = vector.broadcast %cst_21 : f32 to vector<8x128xf32>
    %59 = arith.addf %58, %57 : vector<8x128xf32>
    %60 = arith.divf %58, %59 : vector<8x128xf32>
    %61 = vector.extract_strided_slice %48 {offsets = [0, 256], sizes = [8, 128], strides = [1, 1]} : vector<8x512xf32> to vector<8x128xf32>
    %62 = math.tanh %61 : vector<8x128xf32>
    %63 = vector.extract_strided_slice %48 {offsets = [0, 384], sizes = [8, 128], strides = [1, 1]} : vector<8x512xf32> to vector<8x128xf32>
    %64 = arith.negf %63 : vector<8x128xf32>
    %65 = math.exp %64 : vector<8x128xf32>
    %cst_22 = arith.constant 1.000000e+00 : f32
    %66 = vector.broadcast %cst_22 : f32 to vector<8x128xf32>
    %67 = arith.addf %66, %65 : vector<8x128xf32>
    %68 = arith.divf %66, %67 : vector<8x128xf32>
    %69 = arith.mulf %60, %38 : vector<8x128xf32>
    %70 = arith.mulf %54, %62 : vector<8x128xf32>
    %71 = arith.addf %69, %70 : vector<8x128xf32>
    %72 = math.tanh %71 : vector<8x128xf32>
    %73 = arith.mulf %68, %72 : vector<8x128xf32>
    %74 = arith.index_cast %44 : i32 to index
    %c0_23 = arith.constant 0 : index
    %75 = vector.load %arg10[%74, %c0_23] : memref<64x128xf32, #tpu.memory_space<vmem>>, vector<8x128xf32>
    tpu.vector_store %arg10[%74, %c0_23], %73 {strides = array<i32>} : memref<64x128xf32, #tpu.memory_space<vmem>>, vector<8x128xf32>,
    %c2_i32 = arith.constant 2 : i32
    %c8_i32_24 = arith.constant 8 : i32
    %76 = arith.muli %c2_i32, %c8_i32_24 : i32
    %77 = tpu.assume_multiple %76, 8 : i32
    %78 = arith.index_cast %77 : i32 to index
    %c0_25 = arith.constant 0 : index
    %79 = vector.load %arg9[%78, %c0_25] : memref<64x512xf32, #tpu.memory_space<vmem>>, vector<8x512xf32>
    %cst_26 = arith.constant dense<0.000000e+00> : vector<8x512xf32>
    %80 = tpu.matmul %73, %7, %cst_26 {dimension_numbers = #tpu.dot_dimension_numbers<[1], [0], [0], [1], [0, 0, 1, 1], [], []>} : vector<8x128xf32>, vector<128x512xf32>, vector<8x512xf32> -> vector<8x512xf32>
    %81 = arith.addf %79, %80 : vector<8x512xf32>
    %82 = vector.extract_strided_slice %81 {offsets = [0, 0], sizes = [8, 128], strides = [1, 1]} : vector<8x512xf32> to vector<8x128xf32>
    %83 = arith.negf %82 : vector<8x128xf32>
    %84 = math.exp %83 : vector<8x128xf32>
    %cst_27 = arith.constant 1.000000e+00 : f32
    %85 = vector.broadcast %cst_27 : f32 to vector<8x128xf32>
    %86 = arith.addf %85, %84 : vector<8x128xf32>
    %87 = arith.divf %85, %86 : vector<8x128xf32>
    %88 = vector.extract_strided_slice %81 {offsets = [0, 128], sizes = [8, 128], strides = [1, 1]} : vector<8x512xf32> to vector<8x128xf32>
    %89 = arith.negf %88 : vector<8x128xf32>
    %90 = math.exp %89 : vector<8x128xf32>
    %cst_28 = arith.constant 1.000000e+00 : f32
    %91 = vector.broadcast %cst_28 : f32 to vector<8x128xf32>
    %92 = arith.addf %91, %90 : vector<8x128xf32>
    %93 = arith.divf %91, %92 : vector<8x128xf32>
    %94 = vector.extract_strided_slice %81 {offsets = [0, 256], sizes = [8, 128], strides = [1, 1]} : vector<8x512xf32> to vector<8x128xf32>
    %95 = math.tanh %94 : vector<8x128xf32>
    %96 = vector.extract_strided_slice %81 {offsets = [0, 384], sizes = [8, 128], strides = [1, 1]} : vector<8x512xf32> to vector<8x128xf32>
    %97 = arith.negf %96 : vector<8x128xf32>
    %98 = math.exp %97 : vector<8x128xf32>
    %cst_29 = arith.constant 1.000000e+00 : f32
    %99 = vector.broadcast %cst_29 : f32 to vector<8x128xf32>
    %100 = arith.addf %99, %98 : vector<8x128xf32>
    %101 = arith.divf %99, %100 : vector<8x128xf32>
    %102 = arith.mulf %93, %71 : vector<8x128xf32>
    %103 = arith.mulf %87, %95 : vector<8x128xf32>
    %104 = arith.addf %102, %103 : vector<8x128xf32>
    %105 = math.tanh %104 : vector<8x128xf32>
    %106 = arith.mulf %101, %105 : vector<8x128xf32>
    %107 = arith.index_cast %77 : i32 to index
    %c0_30 = arith.constant 0 : index
    %108 = vector.load %arg10[%107, %c0_30] : memref<64x128xf32, #tpu.memory_space<vmem>>, vector<8x128xf32>
    tpu.vector_store %arg10[%107, %c0_30], %106 {strides = array<i32>} : memref<64x128xf32, #tpu.memory_space<vmem>>, vector<8x128xf32>,
    %c3_i32 = arith.constant 3 : i32
    %c8_i32_31 = arith.constant 8 : i32
    %109 = arith.muli %c3_i32, %c8_i32_31 : i32
    %110 = tpu.assume_multiple %109, 8 : i32
    %111 = arith.index_cast %110 : i32 to index
    %c0_32 = arith.constant 0 : index
    %112 = vector.load %arg9[%111, %c0_32] : memref<64x512xf32, #tpu.memory_space<vmem>>, vector<8x512xf32>
    %cst_33 = arith.constant dense<0.000000e+00> : vector<8x512xf32>
    %113 = tpu.matmul %106, %7, %cst_33 {dimension_numbers = #tpu.dot_dimension_numbers<[1], [0], [0], [1], [0, 0, 1, 1], [], []>} : vector<8x128xf32>, vector<128x512xf32>, vector<8x512xf32> -> vector<8x512xf32>
    %114 = arith.addf %112, %113 : vector<8x512xf32>
    %115 = vector.extract_strided_slice %114 {offsets = [0, 0], sizes = [8, 128], strides = [1, 1]} : vector<8x512xf32> to vector<8x128xf32>
    %116 = arith.negf %115 : vector<8x128xf32>
    %117 = math.exp %116 : vector<8x128xf32>
    %cst_34 = arith.constant 1.000000e+00 : f32
    %118 = vector.broadcast %cst_34 : f32 to vector<8x128xf32>
    %119 = arith.addf %118, %117 : vector<8x128xf32>
    %120 = arith.divf %118, %119 : vector<8x128xf32>
    %121 = vector.extract_strided_slice %114 {offsets = [0, 128], sizes = [8, 128], strides = [1, 1]} : vector<8x512xf32> to vector<8x128xf32>
    %122 = arith.negf %121 : vector<8x128xf32>
    %123 = math.exp %122 : vector<8x128xf32>
    %cst_35 = arith.constant 1.000000e+00 : f32
    %124 = vector.broadcast %cst_35 : f32 to vector<8x128xf32>
    %125 = arith.addf %124, %123 : vector<8x128xf32>
    %126 = arith.divf %124, %125 : vector<8x128xf32>
    %127 = vector.extract_strided_slice %114 {offsets = [0, 256], sizes = [8, 128], strides = [1, 1]} : vector<8x512xf32> to vector<8x128xf32>
    %128 = math.tanh %127 : vector<8x128xf32>
    %129 = vector.extract_strided_slice %114 {offsets = [0, 384], sizes = [8, 128], strides = [1, 1]} : vector<8x512xf32> to vector<8x128xf32>
    %130 = arith.negf %129 : vector<8x128xf32>
    %131 = math.exp %130 : vector<8x128xf32>
    %cst_36 = arith.constant 1.000000e+00 : f32
    %132 = vector.broadcast %cst_36 : f32 to vector<8x128xf32>
    %133 = arith.addf %132, %131 : vector<8x128xf32>
    %134 = arith.divf %132, %133 : vector<8x128xf32>
    %135 = arith.mulf %126, %104 : vector<8x128xf32>
    %136 = arith.mulf %120, %128 : vector<8x128xf32>
    %137 = arith.addf %135, %136 : vector<8x128xf32>
    %138 = math.tanh %137 : vector<8x128xf32>
    %139 = arith.mulf %134, %138 : vector<8x128xf32>
    %140 = arith.index_cast %110 : i32 to index
    %c0_37 = arith.constant 0 : index
    %141 = vector.load %arg10[%140, %c0_37] : memref<64x128xf32, #tpu.memory_space<vmem>>, vector<8x128xf32>
    tpu.vector_store %arg10[%140, %c0_37], %139 {strides = array<i32>} : memref<64x128xf32, #tpu.memory_space<vmem>>, vector<8x128xf32>,
    %c4_i32 = arith.constant 4 : i32
    %c8_i32_38 = arith.constant 8 : i32
    %142 = arith.muli %c4_i32, %c8_i32_38 : i32
    %143 = tpu.assume_multiple %142, 8 : i32
    %144 = arith.index_cast %143 : i32 to index
    %c0_39 = arith.constant 0 : index
    %145 = vector.load %arg9[%144, %c0_39] : memref<64x512xf32, #tpu.memory_space<vmem>>, vector<8x512xf32>
    %cst_40 = arith.constant dense<0.000000e+00> : vector<8x512xf32>
    %146 = tpu.matmul %139, %7, %cst_40 {dimension_numbers = #tpu.dot_dimension_numbers<[1], [0], [0], [1], [0, 0, 1, 1], [], []>} : vector<8x128xf32>, vector<128x512xf32>, vector<8x512xf32> -> vector<8x512xf32>
    %147 = arith.addf %145, %146 : vector<8x512xf32>
    %148 = vector.extract_strided_slice %147 {offsets = [0, 0], sizes = [8, 128], strides = [1, 1]} : vector<8x512xf32> to vector<8x128xf32>
    %149 = arith.negf %148 : vector<8x128xf32>
    %150 = math.exp %149 : vector<8x128xf32>
    %cst_41 = arith.constant 1.000000e+00 : f32
    %151 = vector.broadcast %cst_41 : f32 to vector<8x128xf32>
    %152 = arith.addf %151, %150 : vector<8x128xf32>
    %153 = arith.divf %151, %152 : vector<8x128xf32>
    %154 = vector.extract_strided_slice %147 {offsets = [0, 128], sizes = [8, 128], strides = [1, 1]} : vector<8x512xf32> to vector<8x128xf32>
    %155 = arith.negf %154 : vector<8x128xf32>
    %156 = math.exp %155 : vector<8x128xf32>
    %cst_42 = arith.constant 1.000000e+00 : f32
    %157 = vector.broadcast %cst_42 : f32 to vector<8x128xf32>
    %158 = arith.addf %157, %156 : vector<8x128xf32>
    %159 = arith.divf %157, %158 : vector<8x128xf32>
    %160 = vector.extract_strided_slice %147 {offsets = [0, 256], sizes = [8, 128], strides = [1, 1]} : vector<8x512xf32> to vector<8x128xf32>
    %161 = math.tanh %160 : vector<8x128xf32>
    %162 = vector.extract_strided_slice %147 {offsets = [0, 384], sizes = [8, 128], strides = [1, 1]} : vector<8x512xf32> to vector<8x128xf32>
    %163 = arith.negf %162 : vector<8x128xf32>
    %164 = math.exp %163 : vector<8x128xf32>
    %cst_43 = arith.constant 1.000000e+00 : f32
    %165 = vector.broadcast %cst_43 : f32 to vector<8x128xf32>
    %166 = arith.addf %165, %164 : vector<8x128xf32>
    %167 = arith.divf %165, %166 : vector<8x128xf32>
    %168 = arith.mulf %159, %137 : vector<8x128xf32>
    %169 = arith.mulf %153, %161 : vector<8x128xf32>
    %170 = arith.addf %168, %169 : vector<8x128xf32>
    %171 = math.tanh %170 : vector<8x128xf32>
    %172 = arith.mulf %167, %171 : vector<8x128xf32>
    %173 = arith.index_cast %143 : i32 to index
    %c0_44 = arith.constant 0 : index
    %174 = vector.load %arg10[%173, %c0_44] : memref<64x128xf32, #tpu.memory_space<vmem>>, vector<8x128xf32>
    tpu.vector_store %arg10[%173, %c0_44], %172 {strides = array<i32>} : memref<64x128xf32, #tpu.memory_space<vmem>>, vector<8x128xf32>,
    %c5_i32 = arith.constant 5 : i32
    %c8_i32_45 = arith.constant 8 : i32
    %175 = arith.muli %c5_i32, %c8_i32_45 : i32
    %176 = tpu.assume_multiple %175, 8 : i32
    %177 = arith.index_cast %176 : i32 to index
    %c0_46 = arith.constant 0 : index
    %178 = vector.load %arg9[%177, %c0_46] : memref<64x512xf32, #tpu.memory_space<vmem>>, vector<8x512xf32>
    %cst_47 = arith.constant dense<0.000000e+00> : vector<8x512xf32>
    %179 = tpu.matmul %172, %7, %cst_47 {dimension_numbers = #tpu.dot_dimension_numbers<[1], [0], [0], [1], [0, 0, 1, 1], [], []>} : vector<8x128xf32>, vector<128x512xf32>, vector<8x512xf32> -> vector<8x512xf32>
    %180 = arith.addf %178, %179 : vector<8x512xf32>
    %181 = vector.extract_strided_slice %180 {offsets = [0, 0], sizes = [8, 128], strides = [1, 1]} : vector<8x512xf32> to vector<8x128xf32>
    %182 = arith.negf %181 : vector<8x128xf32>
    %183 = math.exp %182 : vector<8x128xf32>
    %cst_48 = arith.constant 1.000000e+00 : f32
    %184 = vector.broadcast %cst_48 : f32 to vector<8x128xf32>
    %185 = arith.addf %184, %183 : vector<8x128xf32>
    %186 = arith.divf %184, %185 : vector<8x128xf32>
    %187 = vector.extract_strided_slice %180 {offsets = [0, 128], sizes = [8, 128], strides = [1, 1]} : vector<8x512xf32> to vector<8x128xf32>
    %188 = arith.negf %187 : vector<8x128xf32>
    %189 = math.exp %188 : vector<8x128xf32>
    %cst_49 = arith.constant 1.000000e+00 : f32
    %190 = vector.broadcast %cst_49 : f32 to vector<8x128xf32>
    %191 = arith.addf %190, %189 : vector<8x128xf32>
    %192 = arith.divf %190, %191 : vector<8x128xf32>
    %193 = vector.extract_strided_slice %180 {offsets = [0, 256], sizes = [8, 128], strides = [1, 1]} : vector<8x512xf32> to vector<8x128xf32>
    %194 = math.tanh %193 : vector<8x128xf32>
    %195 = vector.extract_strided_slice %180 {offsets = [0, 384], sizes = [8, 128], strides = [1, 1]} : vector<8x512xf32> to vector<8x128xf32>
    %196 = arith.negf %195 : vector<8x128xf32>
    %197 = math.exp %196 : vector<8x128xf32>
    %cst_50 = arith.constant 1.000000e+00 : f32
    %198 = vector.broadcast %cst_50 : f32 to vector<8x128xf32>
    %199 = arith.addf %198, %197 : vector<8x128xf32>
    %200 = arith.divf %198, %199 : vector<8x128xf32>
    %201 = arith.mulf %192, %170 : vector<8x128xf32>
    %202 = arith.mulf %186, %194 : vector<8x128xf32>
    %203 = arith.addf %201, %202 : vector<8x128xf32>
    %204 = math.tanh %203 : vector<8x128xf32>
    %205 = arith.mulf %200, %204 : vector<8x128xf32>
    %206 = arith.index_cast %176 : i32 to index
    %c0_51 = arith.constant 0 : index
    %207 = vector.load %arg10[%206, %c0_51] : memref<64x128xf32, #tpu.memory_space<vmem>>, vector<8x128xf32>
    tpu.vector_store %arg10[%206, %c0_51], %205 {strides = array<i32>} : memref<64x128xf32, #tpu.memory_space<vmem>>, vector<8x128xf32>,
    %c6_i32 = arith.constant 6 : i32
    %c8_i32_52 = arith.constant 8 : i32
    %208 = arith.muli %c6_i32, %c8_i32_52 : i32
    %209 = tpu.assume_multiple %208, 8 : i32
    %210 = arith.index_cast %209 : i32 to index
    %c0_53 = arith.constant 0 : index
    %211 = vector.load %arg9[%210, %c0_53] : memref<64x512xf32, #tpu.memory_space<vmem>>, vector<8x512xf32>
    %cst_54 = arith.constant dense<0.000000e+00> : vector<8x512xf32>
    %212 = tpu.matmul %205, %7, %cst_54 {dimension_numbers = #tpu.dot_dimension_numbers<[1], [0], [0], [1], [0, 0, 1, 1], [], []>} : vector<8x128xf32>, vector<128x512xf32>, vector<8x512xf32> -> vector<8x512xf32>
    %213 = arith.addf %211, %212 : vector<8x512xf32>
    %214 = vector.extract_strided_slice %213 {offsets = [0, 0], sizes = [8, 128], strides = [1, 1]} : vector<8x512xf32> to vector<8x128xf32>
    %215 = arith.negf %214 : vector<8x128xf32>
    %216 = math.exp %215 : vector<8x128xf32>
    %cst_55 = arith.constant 1.000000e+00 : f32
    %217 = vector.broadcast %cst_55 : f32 to vector<8x128xf32>
    %218 = arith.addf %217, %216 : vector<8x128xf32>
    %219 = arith.divf %217, %218 : vector<8x128xf32>
    %220 = vector.extract_strided_slice %213 {offsets = [0, 128], sizes = [8, 128], strides = [1, 1]} : vector<8x512xf32> to vector<8x128xf32>
    %221 = arith.negf %220 : vector<8x128xf32>
    %222 = math.exp %221 : vector<8x128xf32>
    %cst_56 = arith.constant 1.000000e+00 : f32
    %223 = vector.broadcast %cst_56 : f32 to vector<8x128xf32>
    %224 = arith.addf %223, %222 : vector<8x128xf32>
    %225 = arith.divf %223, %224 : vector<8x128xf32>
    %226 = vector.extract_strided_slice %213 {offsets = [0, 256], sizes = [8, 128], strides = [1, 1]} : vector<8x512xf32> to vector<8x128xf32>
    %227 = math.tanh %226 : vector<8x128xf32>
    %228 = vector.extract_strided_slice %213 {offsets = [0, 384], sizes = [8, 128], strides = [1, 1]} : vector<8x512xf32> to vector<8x128xf32>
    %229 = arith.negf %228 : vector<8x128xf32>
    %230 = math.exp %229 : vector<8x128xf32>
    %cst_57 = arith.constant 1.000000e+00 : f32
    %231 = vector.broadcast %cst_57 : f32 to vector<8x128xf32>
    %232 = arith.addf %231, %230 : vector<8x128xf32>
    %233 = arith.divf %231, %232 : vector<8x128xf32>
    %234 = arith.mulf %225, %203 : vector<8x128xf32>
    %235 = arith.mulf %219, %227 : vector<8x128xf32>
    %236 = arith.addf %234, %235 : vector<8x128xf32>
    %237 = math.tanh %236 : vector<8x128xf32>
    %238 = arith.mulf %233, %237 : vector<8x128xf32>
    %239 = arith.index_cast %209 : i32 to index
    %c0_58 = arith.constant 0 : index
    %240 = vector.load %arg10[%239, %c0_58] : memref<64x128xf32, #tpu.memory_space<vmem>>, vector<8x128xf32>
    tpu.vector_store %arg10[%239, %c0_58], %238 {strides = array<i32>} : memref<64x128xf32, #tpu.memory_space<vmem>>, vector<8x128xf32>,
    %c7_i32 = arith.constant 7 : i32
    %c8_i32_59 = arith.constant 8 : i32
    %241 = arith.muli %c7_i32, %c8_i32_59 : i32
    %242 = tpu.assume_multiple %241, 8 : i32
    %243 = arith.index_cast %242 : i32 to index
    %c0_60 = arith.constant 0 : index
    %244 = vector.load %arg9[%243, %c0_60] : memref<64x512xf32, #tpu.memory_space<vmem>>, vector<8x512xf32>
    %cst_61 = arith.constant dense<0.000000e+00> : vector<8x512xf32>
    %245 = tpu.matmul %238, %7, %cst_61 {dimension_numbers = #tpu.dot_dimension_numbers<[1], [0], [0], [1], [0, 0, 1, 1], [], []>} : vector<8x128xf32>, vector<128x512xf32>, vector<8x512xf32> -> vector<8x512xf32>
    %246 = arith.addf %244, %245 : vector<8x512xf32>
    %247 = vector.extract_strided_slice %246 {offsets = [0, 0], sizes = [8, 128], strides = [1, 1]} : vector<8x512xf32> to vector<8x128xf32>
    %248 = arith.negf %247 : vector<8x128xf32>
    %249 = math.exp %248 : vector<8x128xf32>
    %cst_62 = arith.constant 1.000000e+00 : f32
    %250 = vector.broadcast %cst_62 : f32 to vector<8x128xf32>
    %251 = arith.addf %250, %249 : vector<8x128xf32>
    %252 = arith.divf %250, %251 : vector<8x128xf32>
    %253 = vector.extract_strided_slice %246 {offsets = [0, 128], sizes = [8, 128], strides = [1, 1]} : vector<8x512xf32> to vector<8x128xf32>
    %254 = arith.negf %253 : vector<8x128xf32>
    %255 = math.exp %254 : vector<8x128xf32>
    %cst_63 = arith.constant 1.000000e+00 : f32
    %256 = vector.broadcast %cst_63 : f32 to vector<8x128xf32>
    %257 = arith.addf %256, %255 : vector<8x128xf32>
    %258 = arith.divf %256, %257 : vector<8x128xf32>
    %259 = vector.extract_strided_slice %246 {offsets = [0, 256], sizes = [8, 128], strides = [1, 1]} : vector<8x512xf32> to vector<8x128xf32>
    %260 = math.tanh %259 : vector<8x128xf32>
    %261 = vector.extract_strided_slice %246 {offsets = [0, 384], sizes = [8, 128], strides = [1, 1]} : vector<8x512xf32> to vector<8x128xf32>
    %262 = arith.negf %261 : vector<8x128xf32>
    %263 = math.exp %262 : vector<8x128xf32>
    %cst_64 = arith.constant 1.000000e+00 : f32
    %264 = vector.broadcast %cst_64 : f32 to vector<8x128xf32>
    %265 = arith.addf %264, %263 : vector<8x128xf32>
    %266 = arith.divf %264, %265 : vector<8x128xf32>
    %267 = arith.mulf %258, %236 : vector<8x128xf32>
    %268 = arith.mulf %252, %260 : vector<8x128xf32>
    %269 = arith.addf %267, %268 : vector<8x128xf32>
    %270 = math.tanh %269 : vector<8x128xf32>
    %271 = arith.mulf %266, %270 : vector<8x128xf32>
    %272 = arith.index_cast %242 : i32 to index
    %c0_65 = arith.constant 0 : index
    %273 = vector.load %arg10[%272, %c0_65] : memref<64x128xf32, #tpu.memory_space<vmem>>, vector<8x128xf32>
    tpu.vector_store %arg10[%272, %c0_65], %271 {strides = array<i32>} : memref<64x128xf32, #tpu.memory_space<vmem>>, vector<8x128xf32>,
    %c8_i32_66 = arith.constant 8 : i32
    %c0_67 = arith.constant 0 : index
    %c0_68 = arith.constant 0 : index
    %274 = vector.load %arg10[%c0_67, %c0_68] : memref<64x128xf32, #tpu.memory_space<vmem>>, vector<64x128xf32>
    %c0_69 = arith.constant 0 : index
    %c0_70 = arith.constant 0 : index
    %275 = vector.load %arg4[%c0_69, %c0_70] : memref<128x128xf32, #tpu.memory_space<vmem>>, vector<128x128xf32>
    %cst_71 = arith.constant dense<0.000000e+00> : vector<64x128xf32>
    %276 = tpu.matmul %274, %275, %cst_71 {dimension_numbers = #tpu.dot_dimension_numbers<[1], [0], [0], [1], [0, 0, 1, 1], [], []>} : vector<64x128xf32>, vector<128x128xf32>, vector<64x128xf32> -> vector<64x128xf32>
    %c0_72 = arith.constant 0 : index
    %c0_73 = arith.constant 0 : index
    %277 = vector.load %arg5[%c0_72, %c0_73] : memref<1x128xf32, #tpu.memory_space<vmem>>, vector<1x128xf32>
    %278 = vector.broadcast %277 : vector<1x128xf32> to vector<64x128xf32>
    %279 = arith.addf %276, %278 : vector<64x128xf32>
    %cst_74 = arith.constant 5.000000e-01 : f32
    %280 = vector.broadcast %cst_74 : f32 to vector<64x128xf32>
    %281 = arith.mulf %280, %279 : vector<64x128xf32>
    %cst_75 = arith.constant 0.707106769 : f32
    %282 = vector.broadcast %cst_75 : f32 to vector<64x128xf32>
    %283 = arith.mulf %279, %282 : vector<64x128xf32>
    %284 = math.erf %283 : vector<64x128xf32>
    %cst_76 = arith.constant 1.000000e+00 : f32
    %285 = vector.broadcast %cst_76 : f32 to vector<64x128xf32>
    %286 = arith.addf %285, %284 : vector<64x128xf32>
    %287 = arith.mulf %281, %286 : vector<64x128xf32>
    %c0_77 = arith.constant 0 : index
    %c0_78 = arith.constant 0 : index
    %288 = vector.load %arg6[%c0_77, %c0_78] : memref<128x128xf32, #tpu.memory_space<vmem>>, vector<128x128xf32>
    %cst_79 = arith.constant dense<0.000000e+00> : vector<64x128xf32>
    %289 = tpu.matmul %287, %288, %cst_79 {dimension_numbers = #tpu.dot_dimension_numbers<[1], [0], [0], [1], [0, 0, 1, 1], [], []>} : vector<64x128xf32>, vector<128x128xf32>, vector<64x128xf32> -> vector<64x128xf32>
    %c0_80 = arith.constant 0 : index
    %c0_81 = arith.constant 0 : index
    %290 = vector.load %arg7[%c0_80, %c0_81] : memref<1x128xf32, #tpu.memory_space<vmem>>, vector<1x128xf32>
    %291 = vector.broadcast %290 : vector<1x128xf32> to vector<64x128xf32>
    %292 = arith.addf %289, %291 : vector<64x128xf32>
    %c0_82 = arith.constant 0 : index
    %c0_83 = arith.constant 0 : index
    %293 = vector.load %arg8[%c0_82, %c0_83] : memref<64x128xf32, #tpu.memory_space<vmem>>, vector<64x128xf32>
    tpu.vector_store %arg8[%c0_82, %c0_83], %292 {strides = array<i32>} : memref<64x128xf32, #tpu.memory_space<vmem>>, vector<64x128xf32>,
    return
  }
}

</mosaic_0001>

<bundles_post_ra>
// kernel: tpu_custom_call.1
= control target key start
LH: loop header
LB: loop body
LE: loop exit
PB: predicated region body
PF: predicated region fallthrough
CT: control target
= control target key end

     0   :  { %13 = vsyncpa [#allocation5], 0  ;;  %s4061_s0 = inlined_call_operand.hbm [shape: f32[64,128], index: 0, kind: input, shape index: {}]   ;;  %s4062_s1 = inlined_call_operand.hbm [shape: f32[128,512], index: 1, kind: input, shape index: {}]   ;;  %s4063_s2 = inlined_call_operand.hbm [shape: f32[128,512], index: 2, kind: input, shape index: {}]   ;;  %s4064_s3 = inlined_call_operand.vmem [shape: f32[1,512], index: 3, kind: input, shape index: {}]   ;;  %s4065_s4 = inlined_call_operand.hbm [shape: f32[128,128], index: 4, kind: input, shape index: {}]   ;;  %s4066_s5 = inlined_call_operand.vmem [shape: f32[1,128], index: 5, kind: input, shape index: {}]   ;;  %s4067_s6 = inlined_call_operand.hbm [shape: f32[128,128], index: 6, kind: input, shape index: {}]   ;;  %s4068_s7 = inlined_call_operand.vmem [shape: f32[1,128], index: 7, kind: input, shape index: {}]   ;;  %s4069_s8 = inlined_call_operand.hbm [shape: f32[64,128], index: 8, kind: output, shape index: {}]  }
   0x1   :  { %14 = vsyncpa [#allocation8], 0 }
   0x2   :  { %15 = vsyncpa [#allocation11], 0 }
   0x3   :  { %16 = vsyncpa [#allocation6], 0  ;;  %s3444_s27 = smov [#allocation7]   ;;  %s3304_s9 = scalar_lea.hbm %s4062_s1, 8192 }
   0x4   :  { %s34_s28 = sshll.u32 %s3444_s27, 4  ;;  %p3305_p0 = scmp.ne.s32.totalorder %s4062_s1, %s3304_s9  ;;  %s35_s28 = int_to_ptr.vmem [resolvable:$true] %s34_s28 }
   0x5   :  { %p3308_p1 = scmp.lt.u32.totalorder %s3304_s9, %s4062_s1 }
   0x7   :  { %p3310_p2 = pnand %p3308_p1, %p3305_p0 }
   0x9   :  { %3313 = shalt.err (!%p3310_p2)
}
   0xa   :  { %s3314_s14 = scalar_lea.vmem %s35_s28, 8192  ;;  %p3319_p4 = scmp.lt.s32.totalorder %s35_s28, %s35_s28 }
   0xb   :  { %p3315_p3 = scmp.ne.s32.totalorder %s35_s28, %s3314_s14  ;;  %p3320_p5 = scmp.lt.s32.totalorder %s3314_s14, %s3314_s14 }
   0xd   :  { %p3321_p6 = por %p3320_p5, %p3319_p4 }
   0xf   :  { %p3322_p7 = pnand %p3321_p6, %p3315_p3 }
  0x11   :  { %3325 = shalt.err (!%p3322_p7)
}
  0x12   :  { %s3445_s15 = smov 512   ;;  %s3446_s16 = smov 32  }
  0x13   :  { %40 = dma.hbm_to_vmem [thread:$0]  %s4062_s1, 8192, %s35_s28, [#allocation8], %s3445_s15, %s3445_s15, %s3446_s16  }
  0x14   :  { %s3447_s19 = smov [#allocation10]   ;;  %s3448_s21 = smov [#allocation4]  }
  0x15   :  { %s60_s20 = sshll.u32 %s3447_s19, 4  ;;  %s22_s22 = sshll.u32 %s3448_s21, 4  ;;  %s61_s20 = int_to_ptr.vmem [resolvable:$true] %s60_s20  ;;  %s23_s22 = int_to_ptr.vmem [resolvable:$true] %s22_s22 }
  0x16   :  { %s3326_s25 = scalar_lea.hbm %s4065_s4, 2048 }
  0x17   :  { %p3327_p8 = scmp.ne.s32.totalorder %s4065_s4, %s3326_s25  ;;  %p3330_p9 = scmp.lt.u32.totalorder %s3326_s25, %s4065_s4 }
  0x19   :  { %p3332_p10 = pnand %p3330_p9, %p3327_p8 }
  0x1b   :  { %3335 = shalt.err (!%p3332_p10)
}
  0x1c   :  { %s3336_s1 = scalar_lea.vmem %s61_s20, 2048  ;;  %p3341_p12 = scmp.lt.s32.totalorder %s61_s20, %s61_s20 }
  0x1d   :  { %p3337_p11 = scmp.ne.s32.totalorder %s61_s20, %s3336_s1  ;;  %p3342_p13 = scmp.lt.s32.totalorder %s3336_s1, %s3336_s1 }
  0x1f   :  { %p3343_p0 = por %p3342_p13, %p3341_p12 }
  0x21   :  { %p3344_p1 = pnand %p3343_p0, %p3337_p11 }
  0x23   :  { %3347 = shalt.err (!%p3344_p1)
}
  0x24   :  { %s3449_s28 = smov 128   ;;  %s3450_s9 = smov 8  }
  0x25   :  { %66 = dma.hbm_to_vmem [thread:$0]  %s4065_s4, 2048, %s61_s20, [#allocation11], %s3449_s28, %s3449_s28, %s3450_s9  }
  0x26   :  { %s3348_s14 = scalar_lea.hbm %s4061_s0, 1024 }
  0x27   :  { %p3349_p2 = scmp.ne.s32.totalorder %s4061_s0, %s3348_s14  ;;  %p3352_p3 = scmp.lt.u32.totalorder %s3348_s14, %s4061_s0 }
  0x29   :  { %p3354_p4 = pnand %p3352_p3, %p3349_p2 }
  0x2b   :  { %3357 = shalt.err (!%p3354_p4)
}
  0x2c   :  { %s3358_s23 = scalar_lea.vmem %s23_s22, 1024  ;;  %p3363_p6 = scmp.lt.s32.totalorder %s23_s22, %s23_s22 }
  0x2d   :  { %p3359_p5 = scmp.ne.s32.totalorder %s23_s22, %s3358_s23  ;;  %p3364_p7 = scmp.lt.s32.totalorder %s3358_s23, %s3358_s23 }
  0x2f   :  { %p3365_p8 = por %p3364_p7, %p3363_p6 }
  0x31   :  { %p3366_p9 = pnand %p3365_p8, %p3359_p5 }
  0x33   :  { %3369 = shalt.err (!%p3366_p9)
}
  0x34   :  { %28 = dma.hbm_to_vmem [thread:$0]  %s4061_s0, 1024, %s23_s22, [#allocation5], %s3449_s28, %s3449_s28, %s3450_s9  }
  0x35   :  { %s3451_s24 = smov [#allocation9]   ;;  %s3452_s26 = smov [#allocation12]  }
  0x36   :  { %s46_s25 = sshll.u32 %s3451_s24, 4  ;;  %s74_s27 = sshll.u32 %s3452_s26, 4  ;;  %s47_s25 = int_to_ptr.vmem [resolvable:$true] %s46_s25  ;;  %s75_s27 = int_to_ptr.vmem [resolvable:$true] %s74_s27 }
  0x37   :  { %s3370_s1 = scalar_lea.hbm %s4063_s2, 8192 }
  0x38   :  { %p3371_p10 = scmp.ne.s32.totalorder %s4063_s2, %s3370_s1  ;;  %p3374_p11 = scmp.lt.u32.totalorder %s3370_s1, %s4063_s2 }
  0x3a   :  { %p3376_p12 = pnand %p3374_p11, %p3371_p10 }
  0x3c   :  { %3379 = shalt.err (!%p3376_p12)
}
  0x3d   :  { %s3380_s0 = scalar_lea.vmem %s47_s25, 8192  ;;  %p3385_p0 = scmp.lt.s32.totalorder %s47_s25, %s47_s25 }
  0x3e   :  { %p3381_p13 = scmp.ne.s32.totalorder %s47_s25, %s3380_s0  ;;  %p3386_p1 = scmp.lt.s32.totalorder %s3380_s0, %s3380_s0 }
  0x40   :  { %p3387_p2 = por %p3386_p1, %p3385_p0 }
  0x42   :  { %p3388_p3 = pnand %p3387_p2, %p3381_p13 }
  0x44   :  { %3391 = shalt.err (!%p3388_p3)
}
  0x45   :  { %52 = dma.hbm_to_vmem [thread:$0]  %s4063_s2, 8192, %s47_s25, [#allocation8], %s3445_s15, %s3445_s15, %s3446_s16  }
  0x46   :  { %s3392_s19 = scalar_lea.hbm %s4067_s6, 2048 }
  0x47   :  { %p3393_p4 = scmp.ne.s32.totalorder %s4067_s6, %s3392_s19  ;;  %p3396_p5 = scmp.lt.u32.totalorder %s3392_s19, %s4067_s6 }
  0x49   :  { %p3398_p6 = pnand %p3396_p5, %p3393_p4 }
  0x4b   :  { %3401 = shalt.err (!%p3398_p6)
}
  0x4c   :  { %s3402_s24 = scalar_lea.vmem %s75_s27, 2048  ;;  %p3407_p8 = scmp.lt.s32.totalorder %s75_s27, %s75_s27 }
  0x4d   :  { %p3403_p7 = scmp.ne.s32.totalorder %s75_s27, %s3402_s24  ;;  %p3408_p9 = scmp.lt.s32.totalorder %s3402_s24, %s3402_s24 }
  0x4f   :  { %p3409_p10 = por %p3408_p9, %p3407_p8 }
  0x51   :  { %p3410_p11 = pnand %p3409_p10, %p3403_p7 }
  0x53   :  { %3413 = shalt.err (!%p3410_p11)
}
  0x54   :  { %80 = dma.hbm_to_vmem [thread:$0]  %s4067_s6, 2048, %s75_s27, [#allocation11], %s3449_s28, %s3449_s28, %s3450_s9  }
  0x55   :  { %3436 = dma.done.wait [#allocation5], 1024  }
  0x56   :  { %3437 = vsyncadd [#allocation5], 4294966272 }
  0x57   :  { %3438 = dma.done.wait [#allocation8], 16384  }
  0x58   :  { %3439 = vsyncadd [#allocation8], 4294950912 }
  0x59   :  { %3440 = dma.done.wait [#allocation11], 4096  }
  0x5a   :  { %3441 = vsyncadd [#allocation11], 4294963200  ;;  %v3453_v0 = vmov 0.0   ;;  %v107_v1 = vld [vmem:[#allocation7 + $0x8] sm:$0xff]  ;;  %v109_v3 = vld [vmem:[#allocation7 + $0x18] sm:$0xff] }
  0x5b   :  { %256 = vmatprep.mubr.f32.mxu0 %v3453_v0  ;;  %369 = vmatprep.mubr.f32.mxu1 %v3453_v0  ;;  %v111_v2 = vld [vmem:[#allocation7 + $0x28] sm:$0xff]  ;;  %v113_v5 = vld [vmem:[#allocation7 + $0x38] sm:$0xff]  ;;  %v106_v6 = vld [vmem:[#allocation7] sm:$0xff] }
  0x5c   :  { %v2445_v4 = vpack.c.bf16 %v111_v2, %v107_v1  ;;  %v110_v7 = vld [vmem:[#allocation7 + $0x20] sm:$0xff]  ;;  %v2477_v8 = vpack.c.bf16 %v113_v5, %v109_v3  ;;  %v108_v10 = vld [vmem:[#allocation7 + $0x10] sm:$0xff]  ;;  %v115_v12 = vld [vmem:[#allocation7 + $0x48] sm:$0xff] }
  0x5d   :  { %v2447_v9 = vpack.c.bf16 %v110_v7, %v106_v6  ;;  %v112_v11 = vld [vmem:[#allocation7 + $0x30] sm:$0xff]  ;;  %v119_v14 = vld [vmem:[#allocation7 + $0x68] sm:$0xff]  ;;  %v117_v15 = vld [vmem:[#allocation7 + $0x58] sm:$0xff] }
  0x5e   :  { %2446 = vmatprep.subr.bf16.mxu0 %v2445_v4  ;;  %v2479_v13 = vpack.c.bf16 %v112_v11, %v108_v10  ;;  %v121_v16 = vld [vmem:[#allocation7 + $0x78] sm:$0xff]  ;;  %2478 = vmatprep.subr.bf16.mxu1 %v2477_v8  ;;  %v2449_v17 = vpack.c.bf16 %v119_v14, %v115_v12  ;;  %v114_v19 = vld [vmem:[#allocation7 + $0x40] sm:$0xff]  ;;  %v116_v21 = vld [vmem:[#allocation7 + $0x50] sm:$0xff] }
  0x5f   :  { %2448 = vmatpush1.bf16.msra.mxu0 %v2447_v9  ;;  %v2481_v18 = vpack.c.bf16 %v121_v16, %v117_v15  ;;  %v118_v20 = vld [vmem:[#allocation7 + $0x60] sm:$0xff]  ;;  %v120_v23 = vld [vmem:[#allocation7 + $0x70] sm:$0xff]  ;;  %v123_v24 = vld [vmem:[#allocation7 + $0x88] sm:$0xff] }
  0x60   :  { %2480 = vmatpush1.bf16.msra.mxu1 %v2479_v13  ;;  %v2451_v22 = vpack.c.bf16 %v118_v20, %v114_v19  ;;  %v127_v25 = vld [vmem:[#allocation7 + $0xa8] sm:$0xff]  ;;  %2450 = vmatprep.subr.bf16.mxu0 %v2449_v17  ;;  %v2483_v26 = vpack.c.bf16 %v120_v23, %v116_v21  ;;  %v125_v28 = vld [vmem:[#allocation7 + $0x98] sm:$0xff]  ;;  %v122_v30 = vld [vmem:[#allocation7 + $0x80] sm:$0xff] }
  0x61   :  { %2482 = vmatprep.subr.bf16.mxu1 %v2481_v18  ;;  %v2453_v27 = vpack.c.bf16 %v127_v25, %v123_v24  ;;  %v129_v29 = vld [vmem:[#allocation7 + $0xb8] sm:$0xff]  ;;  %v126_v32 = vld [vmem:[#allocation7 + $0xa0] sm:$0xff]  ;;  %v124_v33 = vld [vmem:[#allocation7 + $0x90] sm:$0xff] }
  0x62   :  { %v2485_v31 = vpack.c.bf16 %v129_v29, %v125_v28  ;;  %v128_v34 = vld [vmem:[#allocation7 + $0xb0] sm:$0xff]  ;;  %v2455_v35 = vpack.c.bf16 %v126_v32, %v122_v30  ;;  %v131_v36 = vld [vmem:[#allocation7 + $0xc8] sm:$0xff]  ;;  %v133_v38 = vld [vmem:[#allocation7 + $0xd8] sm:$0xff] }
  0x63   :  { %2452 = vmatpush1.bf16.msra.mxu0 %v2451_v22  ;;  %v135_v37 = vld [vmem:[#allocation7 + $0xe8] sm:$0xff]  ;;  %v2487_v39 = vpack.c.bf16 %v128_v34, %v124_v33  ;;  %v137_v41 = vld [vmem:[#allocation7 + $0xf8] sm:$0xff]  ;;  %v130_v42 = vld [vmem:[#allocation7 + $0xc0] sm:$0xff] }
  0x64   :  { %2484 = vmatpush1.bf16.msra.mxu1 %v2483_v26  ;;  %2454 = vmatprep.subr.bf16.mxu0 %v2453_v27  ;;  %v2457_v40 = vpack.c.bf16 %v135_v37, %v131_v36  ;;  %v134_v43 = vld [vmem:[#allocation7 + $0xe0] sm:$0xff]  ;;  %v2489_v44 = vpack.c.bf16 %v137_v41, %v133_v38  ;;  %v132_v45 = vld [vmem:[#allocation7 + $0xd0] sm:$0xff]  ;;  %v139_v47 = vld [vmem:[#allocation7 + $0x108] sm:$0xff] }
  0x65   :  { %2486 = vmatprep.subr.bf16.mxu1 %v2485_v31  ;;  %v136_v46 = vld [vmem:[#allocation7 + $0xf0] sm:$0xff]  ;;  %v143_v48 = vld [vmem:[#allocation7 + $0x128] sm:$0xff]  ;;  %v141_v49 = vld [vmem:[#allocation7 + $0x118] sm:$0xff]  ;;  %v2459_v51 = vpack.c.bf16 %v134_v43, %v130_v42 }
  0x66   :  { %v145_v50 = vld [vmem:[#allocation7 + $0x138] sm:$0xff]  ;;  %v2491_v52 = vpack.c.bf16 %v136_v46, %v132_v45  ;;  %v2461_v53 = vpack.c.bf16 %v143_v48, %v139_v47  ;;  %v138_v54 = vld [vmem:[#allocation7 + $0x100] sm:$0xff]  ;;  %v140_v56 = vld [vmem:[#allocation7 + $0x110] sm:$0xff] }
  0x67   :  { %2456 = vmatpush1.bf16.msra.mxu0 %v2455_v35  ;;  %v142_v55 = vld [vmem:[#allocation7 + $0x120] sm:$0xff]  ;;  %v2493_v57 = vpack.c.bf16 %v145_v50, %v141_v49  ;;  %v144_v58 = vld [vmem:[#allocation7 + $0x130] sm:$0xff]  ;;  %v147_v59 = vld [vmem:[#allocation7 + $0x148] sm:$0xff] }
  0x68   :  { %2488 = vmatpush1.bf16.msra.mxu1 %v2487_v39  ;;  %2458 = vmatprep.subr.bf16.mxu0 %v2457_v40  ;;  %v151_v60 = vld [vmem:[#allocation7 + $0x168] sm:$0xff]  ;;  %v149_v61 = vld [vmem:[#allocation7 + $0x158] sm:$0xff]  ;;  %v2463_v63 = vpack.c.bf16 %v142_v55, %v138_v54  ;;  %v2495_v1 = vpack.c.bf16 %v144_v58, %v140_v56  ;;  %v146_v3 = vld [vmem:[#allocation7 + $0x140] sm:$0xff] }
  0x69   :  { %2490 = vmatprep.subr.bf16.mxu1 %v2489_v44  ;;  %v153_v62 = vld [vmem:[#allocation7 + $0x178] sm:$0xff]  ;;  %v2465_v2 = vpack.c.bf16 %v151_v60, %v147_v59  ;;  %v150_v4 = vld [vmem:[#allocation7 + $0x160] sm:$0xff]  ;;  %v148_v5 = vld [vmem:[#allocation7 + $0x150] sm:$0xff] }
  0x6a   :  { %v2497_v6 = vpack.c.bf16 %v153_v62, %v149_v61  ;;  %v152_v7 = vld [vmem:[#allocation7 + $0x170] sm:$0xff]  ;;  %v155_v8 = vld [vmem:[#allocation7 + $0x188] sm:$0xff]  ;;  %v157_v10 = vld [vmem:[#allocation7 + $0x198] sm:$0xff]  ;;  %v2467_v12 = vpack.c.bf16 %v150_v4, %v146_v3 }
  0x6b   :  { %2460 = vmatpush1.bf16.msra.mxu0 %v2459_v51  ;;  %v159_v9 = vld [vmem:[#allocation7 + $0x1a8] sm:$0xff]  ;;  %v161_v11 = vld [vmem:[#allocation7 + $0x1b8] sm:$0xff]  ;;  %v2499_v13 = vpack.c.bf16 %v152_v7, %v148_v5  ;;  %v154_v15 = vld [vmem:[#allocation7 + $0x180] sm:$0xff] }
  0x6c   :  { %2492 = vmatpush1.bf16.msra.mxu1 %v2491_v52  ;;  %2462 = vmatprep.subr.bf16.mxu0 %v2461_v53  ;;  %v2469_v14 = vpack.c.bf16 %v159_v9, %v155_v8  ;;  %v158_v16 = vld [vmem:[#allocation7 + $0x1a0] sm:$0xff]  ;;  %v156_v17 = vld [vmem:[#allocation7 + $0x190] sm:$0xff]  ;;  %v2501_v18 = vpack.c.bf16 %v161_v11, %v157_v10  ;;  %v163_v20 = vld [vmem:[#allocation7 + $0x1c8] sm:$0xff] }
  0x6d   :  { %2494 = vmatprep.subr.bf16.mxu1 %v2493_v57  ;;  %v160_v19 = vld [vmem:[#allocation7 + $0x1b0] sm:$0xff]  ;;  %v167_v21 = vld [vmem:[#allocation7 + $0x1e8] sm:$0xff]  ;;  %v165_v22 = vld [vmem:[#allocation7 + $0x1d8] sm:$0xff]  ;;  %v2471_v24 = vpack.c.bf16 %v158_v16, %v154_v15 }
  0x6e   :  { %v169_v23 = vld [vmem:[#allocation7 + $0x1f8] sm:$0xff]  ;;  %v2503_v25 = vpack.c.bf16 %v160_v19, %v156_v17  ;;  %v2473_v26 = vpack.c.bf16 %v167_v21, %v163_v20  ;;  %v162_v27 = vld [vmem:[#allocation7 + $0x1c0] sm:$0xff]  ;;  %v164_v29 = vld [vmem:[#allocation7 + $0x1d0] sm:$0xff] }
  0x6f   :  { %2464 = vmatpush1.bf16.msra.mxu0 %v2463_v63  ;;  %v166_v28 = vld [vmem:[#allocation7 + $0x1e0] sm:$0xff]  ;;  %v2505_v30 = vpack.c.bf16 %v169_v23, %v165_v22  ;;  %v168_v31 = vld [vmem:[#allocation7 + $0x1f0] sm:$0xff]  ;;  %v451_v32 = vld [vmem:[#allocation9 + $0x8] sm:$0xff] }
  0x70   :  { %2496 = vmatpush1.bf16.msra.mxu1 %v2495_v1  ;;  %2466 = vmatprep.subr.bf16.mxu0 %v2465_v2  ;;  %v455_v33 = vld [vmem:[#allocation9 + $0x28] sm:$0xff]  ;;  %v453_v34 = vld [vmem:[#allocation9 + $0x18] sm:$0xff]  ;;  %v2475_v36 = vpack.c.bf16 %v166_v28, %v162_v27  ;;  %v2507_v37 = vpack.c.bf16 %v168_v31, %v164_v29  ;;  %v450_v39 = vld [vmem:[#allocation9] sm:$0xff] }
  0x71   :  { %2498 = vmatprep.subr.bf16.mxu1 %v2497_v6  ;;  %v457_v35 = vld [vmem:[#allocation9 + $0x38] sm:$0xff]  ;;  %v3577_v38 = vpack.c.bf16 %v455_v33, %v451_v32  ;;  %v454_v40 = vld [vmem:[#allocation9 + $0x20] sm:$0xff]  ;;  %v452_v42 = vld [vmem:[#allocation9 + $0x10] sm:$0xff] }
  0x72   :  { %v3579_v41 = vpack.c.bf16 %v457_v35, %v453_v34  ;;  %v456_v43 = vld [vmem:[#allocation9 + $0x30] sm:$0xff]  ;;  %v459_v44 = vld [vmem:[#allocation9 + $0x48] sm:$0xff]  ;;  %v98_v46 = vld [vmem:[#allocation4] sm:$0xff]  ;;  %v3581_v47 = vpack.c.bf16 %v454_v40, %v450_v39 }
  0x73   :  { %2468 = vmatpush1.bf16.msra.mxu0 %v2467_v12  ;;  %v463_v45 = vld [vmem:[#allocation9 + $0x68] sm:$0xff]  ;;  %v461_v48 = vld [vmem:[#allocation9 + $0x58] sm:$0xff]  ;;  %v3584_v50 = vpack.c.bf16 %v456_v43, %v452_v42  ;;  %v458_v51 = vld [vmem:[#allocation9 + $0x40] sm:$0xff] }
  0x74   :  { %2500 = vmatpush1.bf16.msra.mxu1 %v2499_v13  ;;  %2470 = vmatprep.subr.bf16.mxu0 %v2469_v14  ;;  %v465_v49 = vld [vmem:[#allocation9 + $0x78] sm:$0xff]  ;;  %v462_v52 = vld [vmem:[#allocation9 + $0x60] sm:$0xff]  ;;  %v3587_v53 = vpack.c.bf16 %v463_v45, %v459_v44  ;;  %v460_v54 = vld [vmem:[#allocation9 + $0x50] sm:$0xff] }
  0x75   :  { %2502 = vmatprep.subr.bf16.mxu1 %v2501_v18  ;;  %v464_v55 = vld [vmem:[#allocation9 + $0x70] sm:$0xff]  ;;  %v3589_v56 = vpack.c.bf16 %v465_v49, %v461_v48  ;;  %v467_v57 = vld [vmem:[#allocation9 + $0x88] sm:$0xff]  ;;  %v3592_v60 = vpack.c.bf16 %v462_v52, %v458_v51  ;;  %v469_v61 = vld [vmem:[#allocation9 + $0x98] sm:$0xff] }
  0x76   :  { %v471_v58 = vld [vmem:[#allocation9 + $0xa8] sm:$0xff]  ;;  %v473_v62 = vld [vmem:[#allocation9 + $0xb8] sm:$0xff]  ;;  %v3596_v63 = vpack.c.bf16 %v464_v55, %v460_v54  ;;  %v466_v1 = vld [vmem:[#allocation9 + $0x80] sm:$0xff] }
  0x77   :  { %2472 = vmatpush1.bf16.msra.mxu0 %v2471_v24  ;;  %v99_v59 = vld [vmem:[#allocation4 + $0x8] sm:$0xff]  ;;  %v470_v2 = vld [vmem:[#allocation9 + $0xa0] sm:$0xff]  ;;  %v3600_v3 = vpack.c.bf16 %v471_v58, %v467_v57  ;;  %v468_v4 = vld [vmem:[#allocation9 + $0x90] sm:$0xff]  ;;  %v3603_v6 = vpack.c.bf16 %v473_v62, %v469_v61 }
  0x78   :  { %2504 = vmatpush1.bf16.msra.mxu1 %v2503_v25  ;;  %2474 = vmatprep.subr.bf16.mxu0 %v2473_v26  ;;  %v472_v5 = vld [vmem:[#allocation9 + $0xb0] sm:$0xff]  ;;  %v475_v7 = vld [vmem:[#allocation9 + $0xc8] sm:$0xff]  ;;  %v3606_v10 = vpack.c.bf16 %v470_v2, %v466_v1  ;;  %v477_v11 = vld [vmem:[#allocation9 + $0xd8] sm:$0xff] }
  0x79   :  { %2506 = vmatprep.subr.bf16.mxu1 %v2505_v30  ;;  %v479_v8 = vld [vmem:[#allocation9 + $0xe8] sm:$0xff]  ;;  %v100_v9 = vld [vmem:[#allocation4 + $0x10] sm:$0xff]  ;;  %v481_v12 = vld [vmem:[#allocation9 + $0xf8] sm:$0xff]  ;;  %v3610_v13 = vpack.c.bf16 %v472_v5, %v468_v4 }
  0x7a   :  { %v474_v14 = vld [vmem:[#allocation9 + $0xc0] sm:$0xff]  ;;  %v3614_v16 = vpack.c.bf16 %v479_v8, %v475_v7  ;;  %v476_v17 = vld [vmem:[#allocation9 + $0xd0] sm:$0xff]  ;;  %v3617_v19 = vpack.c.bf16 %v481_v12, %v477_v11  ;;  %v483_v20 = vld [vmem:[#allocation9 + $0x108] sm:$0xff] }
  0x7b   :  { %2476 = vmatpush1.bf16.msra.mxu0 %v2475_v36  ;;  %v478_v15 = vld [vmem:[#allocation9 + $0xe0] sm:$0xff]  ;;  %v480_v18 = vld [vmem:[#allocation9 + $0xf0] sm:$0xff]  ;;  %v487_v21 = vld [vmem:[#allocation9 + $0x128] sm:$0xff] }
  0x7c   :  { %2508 = vmatpush1.bf16.msra.mxu1 %v2507_v37  ;;  %2510 = vmatprep.subr.bf16.mxu0 %v3577_v38  ;;  %v101_v22 = vld [vmem:[#allocation4 + $0x18] sm:$0xff]  ;;  %v3620_v23 = vpack.c.bf16 %v478_v15, %v474_v14  ;;  %v3624_v26 = vpack.c.bf16 %v480_v18, %v476_v17  ;;  %v482_v27 = vld [vmem:[#allocation9 + $0x100] sm:$0xff]  ;;  %v3628_v29 = vpack.c.bf16 %v487_v21, %v483_v20  ;;  %v484_v30 = vld [vmem:[#allocation9 + $0x110] sm:$0xff] }
  0x7d   :  { %2542 = vmatprep.subr.bf16.mxu1 %v3579_v41  ;;  %v485_v24 = vld [vmem:[#allocation9 + $0x118] sm:$0xff]  ;;  %v486_v28 = vld [vmem:[#allocation9 + $0x120] sm:$0xff]  ;;  %v488_v31 = vld [vmem:[#allocation9 + $0x130] sm:$0xff] }
  0x7e   :  { %257 = vmatmul.mubr.f32.vlgmr.msra.gmra.mrb[0].mxu0 %v98_v46  ;;  %v489_v25 = vld [vmem:[#allocation9 + $0x138] sm:$0xff]  ;;  %v491_v33 = vld [vmem:[#allocation9 + $0x148] sm:$0xff]  ;;  %v102_v35 = vld [vmem:[#allocation4 + $0x20] sm:$0xff]  ;;  %v3634_v36 = vpack.c.bf16 %v486_v28, %v482_v27  ;;  %v3638_v40 = vpack.c.bf16 %v488_v31, %v484_v30  ;;  %v172_v28 = vlaneseq }
  0x7f   :  { %370 = vmatmul.mubr.f32.vlgmr.msra.gmra.mrb[0].mxu1 %v98_v46  ;;  %2512 = vmatpush1.bf16.msra.mxu0 %v3581_v47  ;;  %v3631_v32 = vpack.c.bf16 %v489_v25, %v485_v24  ;;  %v495_v34 = vld [vmem:[#allocation9 + $0x168] sm:$0xff]  ;;  %v493_v37 = vld [vmem:[#allocation9 + $0x158] sm:$0xff]  ;;  %v490_v42 = vld [vmem:[#allocation9 + $0x140] sm:$0xff] }
  0x80   :  { %2544 = vmatpush1.bf16.msra.mxu1 %v3584_v50  ;;  %262 = vmatprep.mubr.f32.mxu0 %v3453_v0  ;;  %v497_v39 = vld [vmem:[#allocation9 + $0x178] sm:$0xff]  ;;  %v494_v43 = vld [vmem:[#allocation9 + $0x160] sm:$0xff]  ;;  %v3642_v44 = vpack.c.bf16 %v495_v34, %v491_v33  ;;  %v492_v45 = vld [vmem:[#allocation9 + $0x150] sm:$0xff]  ;;  %v173_v30 = vshrl.u32 %v172_v28, 7 }
  0x81   :  { %375 = vmatprep.mubr.f32.mxu1 %v3453_v0  ;;  %2514 = vmatprep.subr.bf16.mxu0 %v3587_v53  ;;  %v496_v46 = vld [vmem:[#allocation9 + $0x170] sm:$0xff]  ;;  %v3645_v48 = vpack.c.bf16 %v497_v39, %v493_v37  ;;  %v499_v49 = vld [vmem:[#allocation9 + $0x188] sm:$0xff]  ;;  %v3648_v54 = vpack.c.bf16 %v494_v43, %v490_v42  ;;  %v501_v55 = vld [vmem:[#allocation9 + $0x198] sm:$0xff] }
  0x82   :  { %263 = vmatmul.mubr.f32.gmra.mrb[2].mxu0 %v99_v59  ;;  %2546 = vmatprep.subr.bf16.mxu1 %v3589_v56  ;;  %v503_v51 = vld [vmem:[#allocation9 + $0x1a8] sm:$0xff]  ;;  %v505_v57 = vld [vmem:[#allocation9 + $0x1b8] sm:$0xff]  ;;  %v3652_v58 = vpack.c.bf16 %v496_v46, %v492_v45  ;;  %v502_v61 = vld [vmem:[#allocation9 + $0x1a0] sm:$0xff]  ;;  %v174_v31 = vsub.s32 0, %v173_v30  ;;  %v178_v34 = vsub.s32 1, %v173_v30  ;;  %v186_v42 = vsub.s32 3, %v173_v30 }
  0x83   :  { %376 = vmatmul.mubr.f32.gmra.mrb[2].mxu1 %v99_v59  ;;  %2516 = vmatpush1.bf16.msra.mxu0 %v3592_v60  ;;  %v103_v52 = vld [vmem:[#allocation4 + $0x28] sm:$0xff]  ;;  %v498_v59 = vld [vmem:[#allocation9 + $0x180] sm:$0xff]  ;;  %v3656_v62 = vpack.c.bf16 %v503_v51, %v499_v49  ;;  %v500_v1 = vld [vmem:[#allocation9 + $0x190] sm:$0xff]  ;;  %v3659_v4 = vpack.c.bf16 %v505_v57, %v501_v55 }
  0x84   :  { %2548 = vmatpush1.bf16.msra.mxu1 %v3596_v63  ;;  %268 = vmatprep.mubr.f32.mxu0 %v3453_v0  ;;  %v504_v2 = vld [vmem:[#allocation9 + $0x1b0] sm:$0xff]  ;;  %v507_v5 = vld [vmem:[#allocation9 + $0x1c8] sm:$0xff]  ;;  %v509_v11 = vld [vmem:[#allocation9 + $0x1d8] sm:$0xff] }
  0x85   :  { %381 = vmatprep.mubr.f32.mxu1 %v3453_v0  ;;  %2518 = vmatprep.subr.bf16.mxu0 %v3600_v3  ;;  %v511_v7 = vld [vmem:[#allocation9 + $0x1e8] sm:$0xff]  ;;  %v104_v8 = vld [vmem:[#allocation4 + $0x30] sm:$0xff]  ;;  %v513_v12 = vld [vmem:[#allocation9 + $0x1f8] sm:$0xff]  ;;  %v3666_v14 = vpack.c.bf16 %v504_v2, %v500_v1 }
  0x86   :  { %269 = vmatmul.mubr.f32.gmra.mrb[4].mxu0 %v100_v9  ;;  %2550 = vmatprep.subr.bf16.mxu1 %v3603_v6  ;;  %v506_v15 = vld [vmem:[#allocation9 + $0x1c0] sm:$0xff]  ;;  %v3670_v18 = vpack.c.bf16 %v511_v7, %v507_v5  ;;  %v508_v20 = vld [vmem:[#allocation9 + $0x1d0] sm:$0xff]  ;;  %v105_v24 = vld [vmem:[#allocation4 + $0x38] sm:$0xff] }
  0x87   :  { %382 = vmatmul.mubr.f32.gmra.mrb[4].mxu1 %v100_v9  ;;  %2520 = vmatpush1.bf16.msra.mxu0 %v3606_v10  ;;  %v3662_v9 = vpack.c.bf16 %v502_v61, %v498_v59  ;;  %v510_v17 = vld [vmem:[#allocation9 + $0x1e0] sm:$0xff]  ;;  %v512_v21 = vld [vmem:[#allocation9 + $0x1f0] sm:$0xff]  ;;  %v182_v59 = vsub.s32 2, %v173_v30 }
  0x88   :  { %2552 = vmatpush1.bf16.msra.mxu1 %v3610_v13  ;;  %274 = vmatprep.mubr.f32.mxu0 %v3453_v0  ;;  %v3676_v25 = vpack.c.bf16 %v510_v17, %v506_v15  ;;  %v3680_v27 = vpack.c.bf16 %v512_v21, %v508_v20  ;;  %v170_v33 = vld [vmem:[%s4064_s3] sm:$0xf] }
  0x89   :  { %387 = vmatprep.mubr.f32.mxu1 %v3453_v0  ;;  %2522 = vmatprep.subr.bf16.mxu0 %v3614_v16  ;;  %v3732_v37 = vrot.slane %v170_v33, %v178_v34  ;;  %v3736_v57 = vrot.slane %v170_v33, %v186_v42  ;;  %v3739_v1 = vrot.slane %v170_v33, %v182_v59 }
  0x8a   :  { %275 = vmatmul.mubr.f32.gmra.mrb[6].mxu0 %v101_v22  ;;  %2554 = vmatprep.subr.bf16.mxu1 %v3617_v19 }
  0x8b   :  { %388 = vmatmul.mubr.f32.gmra.mrb[6].mxu1 %v101_v22  ;;  %2524 = vmatpush1.bf16.msra.mxu0 %v3620_v23  ;;  %v3673_v22 = vpack.c.bf16 %v513_v12, %v509_v11 }
  0x8c   :  { %2556 = vmatpush1.bf16.msra.mxu1 %v3624_v26  ;;  %280 = vmatprep.mubr.f32.mxu0 %v3453_v0 }
  0x8d   :  { %393 = vmatprep.mubr.f32.mxu1 %v3453_v0  ;;  %2526 = vmatprep.subr.bf16.mxu0 %v3628_v29 }
  0x8e   :  { %281 = vmatmul.mubr.f32.gmra.mrb[8].mxu0 %v102_v35  ;;  %2558 = vmatprep.subr.bf16.mxu1 %v3631_v32 }
  0x8f   :  { %394 = vmatmul.mubr.f32.gmra.mrb[8].mxu1 %v102_v35  ;;  %2528 = vmatpush1.bf16.msra.mxu0 %v3634_v36  ;;  %v3730_v35 = vrot.slane %v170_v33, %v174_v31 }
  0x90   :  { %2560 = vmatpush1.bf16.msra.mxu1 %v3638_v40  ;;  %286 = vmatprep.mubr.f32.mxu0 %v3453_v0 }
  0x91   :  { %399 = vmatprep.mubr.f32.mxu1 %v3453_v0  ;;  %2530 = vmatprep.subr.bf16.mxu0 %v3642_v44 }
  0x92   :  { %287 = vmatmul.mubr.f32.gmra.mrb[10].mxu0 %v103_v52  ;;  %2562 = vmatprep.subr.bf16.mxu1 %v3645_v48 }
  0x93   :  { %400 = vmatmul.mubr.f32.gmra.mrb[10].mxu1 %v103_v52  ;;  %2532 = vmatpush1.bf16.msra.mxu0 %v3648_v54 }
  0x94   :  { %2564 = vmatpush1.bf16.msra.mxu1 %v3652_v58  ;;  %292 = vmatprep.mubr.f32.mxu0 %v3453_v0 }
  0x95   :  { %405 = vmatprep.mubr.f32.mxu1 %v3453_v0  ;;  %2534 = vmatprep.subr.bf16.mxu0 %v3656_v62 }
  0x96   :  { %293 = vmatmul.mubr.f32.gmra.mrb[12].mxu0 %v104_v8  ;;  %2566 = vmatprep.subr.bf16.mxu1 %v3659_v4 }
  0x97   :  { %406 = vmatmul.mubr.f32.gmra.mrb[12].mxu1 %v104_v8  ;;  %2536 = vmatpush1.bf16.msra.mxu0 %v3662_v9 }
  0x98   :  { %2568 = vmatpush1.bf16.msra.mxu1 %v3666_v14  ;;  %298 = vmatprep.mubr.f32.mxu0 %v3453_v0 }
  0x99   :  { %411 = vmatprep.mubr.f32.mxu1 %v3453_v0  ;;  %2538 = vmatprep.subr.bf16.mxu0 %v3670_v18 }
  0x9a   :  { %299 = vmatmul.mubr.f32.gmra.mrb[14].mxu0 %v105_v24  ;;  %2570 = vmatprep.subr.bf16.mxu1 %v3673_v22 }
  0x9b   :  { %412 = vmatmul.mubr.f32.gmra.mrb[14].mxu1 %v105_v24  ;;  %2540 = vmatpush1.bf16.msra.mxu0 %v3676_v25 }
  0x9c   :  { %2572 = vmatpush1.bf16.msra.mxu1 %v3680_v27  ;;  %585 = vmatprep.mubr.f32.mxu0 %v3453_v0 }
  0x9d   :  { %656 = vmatprep.mubr.f32.mxu1 %v3453_v0  ;;  %2574 = vmatprep.subr.bf16.mxu0 %v3577_v38 }
  0x9e   :  { %586 = vmatmul.mubr.f32.vlgmr.msra.gmra.mrb[0].mxu0 %v3453_v0  ;;  %2606 = vmatprep.subr.bf16.mxu1 %v3579_v41 }
  0x9f   :  { %657 = vmatmul.mubr.f32.vlgmr.msra.gmra.mrb[0].mxu1 %v3453_v0  ;;  %2576 = vmatpush1.bf16.msra.mxu0 %v3581_v47 }
  0xa0   :  { %2608 = vmatpush1.bf16.msra.mxu1 %v3584_v50  ;;  %2578 = vmatprep.subr.bf16.mxu0 %v3587_v53 }
  0xa1   :  { %2610 = vmatprep.subr.bf16.mxu1 %v3589_v56  ;;  %763 = vmatprep.mubr.f32.mxu0 %v3453_v0 }
  0xa2   :  { %834 = vmatprep.mubr.f32.mxu1 %v3453_v0 }
  0xa3   :  { %2580 = vmatpush1.bf16.msra.mxu0 %v3592_v60 }
  0xa4   :  { %2612 = vmatpush1.bf16.msra.mxu1 %v3596_v63  ;;  %2582 = vmatprep.subr.bf16.mxu0 %v3600_v3 }
  0xa5   :  { %2614 = vmatprep.subr.bf16.mxu1 %v3603_v6 }
  0xa7   :  { %2584 = vmatpush1.bf16.msra.mxu0 %v3606_v10 }
  0xa8   :  { %2616 = vmatpush1.bf16.msra.mxu1 %v3610_v13  ;;  %2586 = vmatprep.subr.bf16.mxu0 %v3614_v16 }
  0xa9   :  { %2618 = vmatprep.subr.bf16.mxu1 %v3617_v19 }
  0xab   :  { %2588 = vmatpush1.bf16.msra.mxu0 %v3620_v23 }
  0xac   :  { %2620 = vmatpush1.bf16.msra.mxu1 %v3624_v26  ;;  %2590 = vmatprep.subr.bf16.mxu0 %v3628_v29 }
  0xad   :  { %2622 = vmatprep.subr.bf16.mxu1 %v3631_v32 }
  0xaf   :  { %2592 = vmatpush1.bf16.msra.mxu0 %v3634_v36 }
  0xb0   :  { %2624 = vmatpush1.bf16.msra.mxu1 %v3638_v40  ;;  %2594 = vmatprep.subr.bf16.mxu0 %v3642_v44 }
  0xb1   :  { %2626 = vmatprep.subr.bf16.mxu1 %v3645_v48 }
  0xb3   :  { %2596 = vmatpush1.bf16.msra.mxu0 %v3648_v54 }
  0xb4   :  { %2628 = vmatpush1.bf16.msra.mxu1 %v3652_v58  ;;  %2598 = vmatprep.subr.bf16.mxu0 %v3656_v62 }
  0xb5   :  { %2630 = vmatprep.subr.bf16.mxu1 %v3659_v4 }
  0xb7   :  { %2600 = vmatpush1.bf16.msra.mxu0 %v3662_v9 }
  0xb8   :  { %2632 = vmatpush1.bf16.msra.mxu1 %v3666_v14  ;;  %2602 = vmatprep.subr.bf16.mxu0 %v3670_v18 }
  0xb9   :  { %2634 = vmatprep.subr.bf16.mxu1 %v3673_v22 }
  0xbb   :  { %2604 = vmatpush1.bf16.msra.mxu0 %v3676_v25 }
  0xbc   :  { %2636 = vmatpush1.bf16.msra.mxu1 %v3680_v27  ;;  %2638 = vmatprep.subr.bf16.mxu0 %v3577_v38 }
  0xbd   :  { %2670 = vmatprep.subr.bf16.mxu1 %v3579_v41 }
 0x171   :  { %v587_v39 = vpop.f32.mrb[0].mxu0 }
 0x172   :  { %v3085_v43 = vadd.f32 %v587_v39, %v3730_v35  ;;  %v658_v45 = vpop.f32.mrb[0].mxu1  ;;  %v589_v46 = vpop.f32.mrb[1].mxu0 }
 0x173   :  { %v3086_v49 = vadd.f32 %v589_v46, %v3732_v37  ;;  %v660_v51 = vpop.f32.mrb[1].mxu1  ;;  %v3101_v5 = vadd.f32 %v658_v45, %v3739_v1 }
 0x174   :  { %v2283_v52 = vmul.f32 -1.442695, %v3085_v43  ;;  %v3102_v61 = vadd.f32 %v660_v51, %v3736_v57 }
 0x175   :  { %v2284_v55 = vmul.f32 -1.442695, %v3086_v49 }
 0x176   :  { %3160 = vpow2.f32 %v2283_v52  ;;  %v2285_v2 = vmul.f32 -1.442695, %v3102_v61 }
 0x177   :  { %3162 = vpow2.f32 %v2284_v55 }
 0x178   :  { %3164 = vpow2.f32 %v2285_v2 }
 0x179   :  { %3166 = vtanh.f32 %v3101_v5 }
 0x180   :  { %v3161_v7 = vpop.eup %3160 }
 0x181   :  { %v3163_v8 = vpop.eup %3162  ;;  %v670_v11 = vadd.f32 1.0, %v3161_v7 }
 0x182   :  { %v676_v12 = vadd.f32 1.0, %v3163_v8  ;;  %v3165_v15 = vpop.eup %3164 }
 0x183   :  { %3168 = vrcp.f32 %v670_v11  ;;  %v3167_v17 = vpop.eup %3166  ;;  %v683_v28 = vadd.f32 1.0, %v3165_v15 }
 0x184   :  { %3170 = vrcp.f32 %v676_v12 }
 0x185   :  { %3172 = vrcp.f32 %v683_v28 }
 0x18d   :  { %v3169_v20 = vpop.eup %3168 }
 0x18e   :  { %v3171_v21 = vpop.eup %3170  ;;  %v687_v24 = vmul.f32 %v3169_v20, %v3167_v17 }
 0x18f   :  { %v686_v30 = vmul.f32 0.0, %v3171_v21  ;;  %v3173_v33 = vpop.eup %3172 }
 0x191   :  { %v3742_v31 = vadd.f32 %v687_v24, %v686_v30 }
 0x193   :  { %3174 = vtanh.f32 %v3742_v31 }
 0x19d   :  { %v3175_v34 = vpop.eup %3174 }
 0x19e   :  { %v3745_v39 = vmul.f32 %v3175_v34, %v3173_v33 }
 0x1a0   :  { %764 = vmatmul.mubr.f32.vlgmr.msra.gmra.mrb[2].mxu0 %v3745_v39  ;;  %835 = vmatmul.mubr.f32.vlgmr.msra.gmra.mrb[2].mxu1 %v3745_v39 }
 0x1a1   :  { %2640 = vmatpush1.bf16.msra.mxu0 %v3581_v47  ;;  %2672 = vmatpush1.bf16.msra.mxu1 %v3584_v50 }
 0x1a2   :  { %2642 = vmatprep.subr.bf16.mxu0 %v3587_v53  ;;  %2674 = vmatprep.subr.bf16.mxu1 %v3589_v56 }
 0x1a3   :  { %942 = vmatprep.mubr.f32.mxu0 %v3453_v0  ;;  %1013 = vmatprep.mubr.f32.mxu1 %v3453_v0 }
 0x1a5   :  { %2644 = vmatpush1.bf16.msra.mxu0 %v3592_v60  ;;  %2676 = vmatpush1.bf16.msra.mxu1 %v3596_v63 }
 0x1a6   :  { %2646 = vmatprep.subr.bf16.mxu0 %v3600_v3  ;;  %2678 = vmatprep.subr.bf16.mxu1 %v3603_v6 }
 0x1a9   :  { %2648 = vmatpush1.bf16.msra.mxu0 %v3606_v10  ;;  %2680 = vmatpush1.bf16.msra.mxu1 %v3610_v13 }
 0x1aa   :  { %2650 = vmatprep.subr.bf16.mxu0 %v3614_v16  ;;  %2682 = vmatprep.subr.bf16.mxu1 %v3617_v19 }
 0x1ad   :  { %2652 = vmatpush1.bf16.msra.mxu0 %v3620_v23  ;;  %2684 = vmatpush1.bf16.msra.mxu1 %v3624_v26 }
 0x1ae   :  { %2654 = vmatprep.subr.bf16.mxu0 %v3628_v29  ;;  %2686 = vmatprep.subr.bf16.mxu1 %v3631_v32 }
 0x1b1   :  { %2656 = vmatpush1.bf16.msra.mxu0 %v3634_v36  ;;  %2688 = vmatpush1.bf16.msra.mxu1 %v3638_v40 }
 0x1b2   :  { %2658 = vmatprep.subr.bf16.mxu0 %v3642_v44  ;;  %2690 = vmatprep.subr.bf16.mxu1 %v3645_v48 }
 0x1b5   :  { %2660 = vmatpush1.bf16.msra.mxu0 %v3648_v54  ;;  %2692 = vmatpush1.bf16.msra.mxu1 %v3652_v58 }
 0x1b6   :  { %2662 = vmatprep.subr.bf16.mxu0 %v3656_v62  ;;  %2694 = vmatprep.subr.bf16.mxu1 %v3659_v4 }
 0x1b9   :  { %2664 = vmatpush1.bf16.msra.mxu0 %v3662_v9  ;;  %2696 = vmatpush1.bf16.msra.mxu1 %v3666_v14 }
 0x1ba   :  { %2666 = vmatprep.subr.bf16.mxu0 %v3670_v18  ;;  %2698 = vmatprep.subr.bf16.mxu1 %v3673_v22 }
 0x1bd   :  { %2668 = vmatpush1.bf16.msra.mxu0 %v3676_v25  ;;  %2700 = vmatpush1.bf16.msra.mxu1 %v3680_v27 }
 0x1be   :  { %2702 = vmatprep.subr.bf16.mxu0 %v3577_v38  ;;  %2734 = vmatprep.subr.bf16.mxu1 %v3579_v41 }
 0x273   :  { %v765_v42 = vpop.f32.mrb[2].mxu0  ;;  %v836_v43 = vpop.f32.mrb[2].mxu1 }
 0x274   :  { %v3087_v45 = vadd.f32 %v765_v42, %v3730_v35  ;;  %v767_v46 = vpop.f32.mrb[3].mxu0  ;;  %v838_v49 = vpop.f32.mrb[3].mxu1  ;;  %v3103_v2 = vadd.f32 %v836_v43, %v3739_v1 }
 0x275   :  { %v3088_v51 = vadd.f32 %v767_v46, %v3732_v37  ;;  %v3104_v59 = vadd.f32 %v838_v49, %v3736_v57 }
 0x276   :  { %v2286_v52 = vmul.f32 -1.442695, %v3087_v45 }
 0x277   :  { %v2287_v55 = vmul.f32 -1.442695, %v3088_v51  ;;  %v2288_v61 = vmul.f32 -1.442695, %v3104_v59 }
 0x278   :  { %3176 = vpow2.f32 %v2286_v52 }
 0x279   :  { %3178 = vpow2.f32 %v2287_v55 }
 0x27a   :  { %3180 = vpow2.f32 %v2288_v61 }
 0x27b   :  { %3182 = vtanh.f32 %v3103_v2 }
 0x282   :  { %v3177_v5 = vpop.eup %3176 }
 0x283   :  { %v3179_v7 = vpop.eup %3178  ;;  %v848_v8 = vadd.f32 1.0, %v3177_v5 }
 0x284   :  { %v854_v11 = vadd.f32 1.0, %v3179_v7  ;;  %v3181_v12 = vpop.eup %3180 }
 0x285   :  { %3184 = vrcp.f32 %v848_v8  ;;  %v3183_v15 = vpop.eup %3182  ;;  %v861_v24 = vadd.f32 1.0, %v3181_v12 }
 0x286   :  { %3186 = vrcp.f32 %v854_v11 }
 0x287   :  { %3188 = vrcp.f32 %v861_v24 }
 0x28f   :  { %v3185_v17 = vpop.eup %3184 }
 0x290   :  { %v3187_v20 = vpop.eup %3186  ;;  %v865_v21 = vmul.f32 %v3185_v17, %v3183_v15 }
 0x291   :  { %v864_v28 = vmul.f32 %v3187_v20, %v3742_v31  ;;  %v3189_v33 = vpop.eup %3188 }
 0x293   :  { %v3788_v30 = vadd.f32 %v865_v21, %v864_v28 }
 0x295   :  { %3190 = vtanh.f32 %v3788_v30 }
 0x29f   :  { %v3191_v34 = vpop.eup %3190 }
 0x2a0   :  { %v3791_v42 = vmul.f32 %v3191_v34, %v3189_v33 }
 0x2a2   :  { %943 = vmatmul.mubr.f32.vlgmr.msra.gmra.mrb[4].mxu0 %v3791_v42  ;;  %1014 = vmatmul.mubr.f32.vlgmr.msra.gmra.mrb[4].mxu1 %v3791_v42 }
 0x2a3   :  { %2704 = vmatpush1.bf16.msra.mxu0 %v3581_v47  ;;  %2736 = vmatpush1.bf16.msra.mxu1 %v3584_v50 }
 0x2a4   :  { %2706 = vmatprep.subr.bf16.mxu0 %v3587_v53  ;;  %2738 = vmatprep.subr.bf16.mxu1 %v3589_v56 }
 0x2a5   :  { %1121 = vmatprep.mubr.f32.mxu0 %v3453_v0  ;;  %1192 = vmatprep.mubr.f32.mxu1 %v3453_v0 }
 0x2a7   :  { %2708 = vmatpush1.bf16.msra.mxu0 %v3592_v60  ;;  %2740 = vmatpush1.bf16.msra.mxu1 %v3596_v63 }
 0x2a8   :  { %2710 = vmatprep.subr.bf16.mxu0 %v3600_v3  ;;  %2742 = vmatprep.subr.bf16.mxu1 %v3603_v6 }
 0x2ab   :  { %2712 = vmatpush1.bf16.msra.mxu0 %v3606_v10  ;;  %2744 = vmatpush1.bf16.msra.mxu1 %v3610_v13 }
 0x2ac   :  { %2714 = vmatprep.subr.bf16.mxu0 %v3614_v16  ;;  %2746 = vmatprep.subr.bf16.mxu1 %v3617_v19 }
 0x2af   :  { %2716 = vmatpush1.bf16.msra.mxu0 %v3620_v23  ;;  %2748 = vmatpush1.bf16.msra.mxu1 %v3624_v26 }
 0x2b0   :  { %2718 = vmatprep.subr.bf16.mxu0 %v3628_v29  ;;  %2750 = vmatprep.subr.bf16.mxu1 %v3631_v32 }
 0x2b3   :  { %2720 = vmatpush1.bf16.msra.mxu0 %v3634_v36  ;;  %2752 = vmatpush1.bf16.msra.mxu1 %v3638_v40 }
 0x2b4   :  { %2722 = vmatprep.subr.bf16.mxu0 %v3642_v44  ;;  %2754 = vmatprep.subr.bf16.mxu1 %v3645_v48 }
 0x2b7   :  { %2724 = vmatpush1.bf16.msra.mxu0 %v3648_v54  ;;  %2756 = vmatpush1.bf16.msra.mxu1 %v3652_v58 }
 0x2b8   :  { %2726 = vmatprep.subr.bf16.mxu0 %v3656_v62  ;;  %2758 = vmatprep.subr.bf16.mxu1 %v3659_v4 }
 0x2bb   :  { %2728 = vmatpush1.bf16.msra.mxu0 %v3662_v9  ;;  %2760 = vmatpush1.bf16.msra.mxu1 %v3666_v14 }
 0x2bc   :  { %2730 = vmatprep.subr.bf16.mxu0 %v3670_v18  ;;  %2762 = vmatprep.subr.bf16.mxu1 %v3673_v22 }
 0x2bf   :  { %2732 = vmatpush1.bf16.msra.mxu0 %v3676_v25  ;;  %2764 = vmatpush1.bf16.msra.mxu1 %v3680_v27 }
 0x2c0   :  { %2766 = vmatprep.subr.bf16.mxu0 %v3577_v38  ;;  %2798 = vmatprep.subr.bf16.mxu1 %v3579_v41 }
 0x375   :  { %v944_v31 = vpop.f32.mrb[4].mxu0  ;;  %v1015_v43 = vpop.f32.mrb[4].mxu1 }
 0x376   :  { %v3089_v45 = vadd.f32 %v944_v31, %v3730_v35  ;;  %v946_v46 = vpop.f32.mrb[5].mxu0  ;;  %v1017_v49 = vpop.f32.mrb[5].mxu1  ;;  %v3105_v2 = vadd.f32 %v1015_v43, %v3739_v1 }
 0x377   :  { %v3090_v51 = vadd.f32 %v946_v46, %v3732_v37  ;;  %v3106_v59 = vadd.f32 %v1017_v49, %v3736_v57 }
 0x378   :  { %v2289_v52 = vmul.f32 -1.442695, %v3089_v45 }
 0x379   :  { %v2290_v55 = vmul.f32 -1.442695, %v3090_v51  ;;  %v2291_v61 = vmul.f32 -1.442695, %v3106_v59 }
 0x37a   :  { %3192 = vpow2.f32 %v2289_v52 }
 0x37b   :  { %3194 = vpow2.f32 %v2290_v55 }
 0x37c   :  { %3196 = vpow2.f32 %v2291_v61 }
 0x37d   :  { %3198 = vtanh.f32 %v3105_v2 }
 0x384   :  { %v3193_v5 = vpop.eup %3192 }
 0x385   :  { %v3195_v7 = vpop.eup %3194  ;;  %v1027_v8 = vadd.f32 1.0, %v3193_v5 }
 0x386   :  { %v1033_v11 = vadd.f32 1.0, %v3195_v7  ;;  %v3197_v12 = vpop.eup %3196 }
 0x387   :  { %3200 = vrcp.f32 %v1027_v8  ;;  %v3199_v15 = vpop.eup %3198  ;;  %v1040_v24 = vadd.f32 1.0, %v3197_v12 }
 0x388   :  { %3202 = vrcp.f32 %v1033_v11 }
 0x389   :  { %3204 = vrcp.f32 %v1040_v24 }
 0x391   :  { %v3201_v17 = vpop.eup %3200 }
 0x392   :  { %v3203_v20 = vpop.eup %3202  ;;  %v1044_v21 = vmul.f32 %v3201_v17, %v3199_v15 }
 0x393   :  { %v1043_v28 = vmul.f32 %v3203_v20, %v3788_v30  ;;  %v3205_v34 = vpop.eup %3204 }
 0x395   :  { %v3834_v33 = vadd.f32 %v1044_v21, %v1043_v28 }
 0x397   :  { %3206 = vtanh.f32 %v3834_v33 }
 0x3a1   :  { %v3207_v31 = vpop.eup %3206 }
 0x3a2   :  { %v3837_v43 = vmul.f32 %v3207_v31, %v3205_v34 }
 0x3a4   :  { %1122 = vmatmul.mubr.f32.vlgmr.msra.gmra.mrb[6].mxu0 %v3837_v43  ;;  %1193 = vmatmul.mubr.f32.vlgmr.msra.gmra.mrb[6].mxu1 %v3837_v43 }
 0x3a5   :  { %2768 = vmatpush1.bf16.msra.mxu0 %v3581_v47  ;;  %2800 = vmatpush1.bf16.msra.mxu1 %v3584_v50 }
 0x3a6   :  { %2770 = vmatprep.subr.bf16.mxu0 %v3587_v53  ;;  %2802 = vmatprep.subr.bf16.mxu1 %v3589_v56 }
 0x3a7   :  { %1300 = vmatprep.mubr.f32.mxu0 %v3453_v0  ;;  %1371 = vmatprep.mubr.f32.mxu1 %v3453_v0 }
 0x3a9   :  { %2772 = vmatpush1.bf16.msra.mxu0 %v3592_v60  ;;  %2804 = vmatpush1.bf16.msra.mxu1 %v3596_v63 }
 0x3aa   :  { %2774 = vmatprep.subr.bf16.mxu0 %v3600_v3  ;;  %2806 = vmatprep.subr.bf16.mxu1 %v3603_v6 }
 0x3ad   :  { %2776 = vmatpush1.bf16.msra.mxu0 %v3606_v10  ;;  %2808 = vmatpush1.bf16.msra.mxu1 %v3610_v13 }
 0x3ae   :  { %2778 = vmatprep.subr.bf16.mxu0 %v3614_v16  ;;  %2810 = vmatprep.subr.bf16.mxu1 %v3617_v19 }
 0x3b1   :  { %2780 = vmatpush1.bf16.msra.mxu0 %v3620_v23  ;;  %2812 = vmatpush1.bf16.msra.mxu1 %v3624_v26 }
 0x3b2   :  { %2782 = vmatprep.subr.bf16.mxu0 %v3628_v29  ;;  %2814 = vmatprep.subr.bf16.mxu1 %v3631_v32 }
 0x3b5   :  { %2784 = vmatpush1.bf16.msra.mxu0 %v3634_v36  ;;  %2816 = vmatpush1.bf16.msra.mxu1 %v3638_v40 }
 0x3b6   :  { %2786 = vmatprep.subr.bf16.mxu0 %v3642_v44  ;;  %2818 = vmatprep.subr.bf16.mxu1 %v3645_v48 }
 0x3b9   :  { %2788 = vmatpush1.bf16.msra.mxu0 %v3648_v54  ;;  %2820 = vmatpush1.bf16.msra.mxu1 %v3652_v58 }
 0x3ba   :  { %2790 = vmatprep.subr.bf16.mxu0 %v3656_v62  ;;  %2822 = vmatprep.subr.bf16.mxu1 %v3659_v4 }
 0x3bd   :  { %2792 = vmatpush1.bf16.msra.mxu0 %v3662_v9  ;;  %2824 = vmatpush1.bf16.msra.mxu1 %v3666_v14 }
 0x3be   :  { %2794 = vmatprep.subr.bf16.mxu0 %v3670_v18  ;;  %2826 = vmatprep.subr.bf16.mxu1 %v3673_v22 }
 0x3c1   :  { %2796 = vmatpush1.bf16.msra.mxu0 %v3676_v25  ;;  %2828 = vmatpush1.bf16.msra.mxu1 %v3680_v27 }
 0x3c2   :  { %2830 = vmatprep.subr.bf16.mxu0 %v3577_v38  ;;  %2862 = vmatprep.subr.bf16.mxu1 %v3579_v41 }
 0x477   :  { %v1123_v30 = vpop.f32.mrb[6].mxu0  ;;  %v1194_v45 = vpop.f32.mrb[6].mxu1 }
 0x478   :  { %v3091_v46 = vadd.f32 %v1123_v30, %v3730_v35  ;;  %v1125_v49 = vpop.f32.mrb[7].mxu0  ;;  %v1196_v51 = vpop.f32.mrb[7].mxu1  ;;  %v3107_v5 = vadd.f32 %v1194_v45, %v3739_v1 }
 0x479   :  { %v3092_v52 = vadd.f32 %v1125_v49, %v3732_v37  ;;  %v3108_v61 = vadd.f32 %v1196_v51, %v3736_v57 }
 0x47a   :  { %v2292_v55 = vmul.f32 -1.442695, %v3091_v46 }
 0x47b   :  { %v2293_v59 = vmul.f32 -1.442695, %v3092_v52  ;;  %v2294_v2 = vmul.f32 -1.442695, %v3108_v61 }
 0x47c   :  { %3208 = vpow2.f32 %v2292_v55 }
 0x47d   :  { %3210 = vpow2.f32 %v2293_v59 }
 0x47e   :  { %3212 = vpow2.f32 %v2294_v2 }
 0x47f   :  { %3214 = vtanh.f32 %v3107_v5 }
 0x486   :  { %v3209_v7 = vpop.eup %3208 }
 0x487   :  { %v3211_v8 = vpop.eup %3210  ;;  %v1206_v11 = vadd.f32 1.0, %v3209_v7 }
 0x488   :  { %v1212_v12 = vadd.f32 1.0, %v3211_v8  ;;  %v3213_v15 = vpop.eup %3212 }
 0x489   :  { %3216 = vrcp.f32 %v1206_v11  ;;  %v3215_v17 = vpop.eup %3214  ;;  %v1219_v28 = vadd.f32 1.0, %v3213_v15 }
 0x48a   :  { %3218 = vrcp.f32 %v1212_v12 }
 0x48b   :  { %3220 = vrcp.f32 %v1219_v28 }
 0x493   :  { %v3217_v20 = vpop.eup %3216 }
 0x494   :  { %v3219_v21 = vpop.eup %3218  ;;  %v1223_v24 = vmul.f32 %v3217_v20, %v3215_v17 }
 0x495   :  { %v1222_v34 = vmul.f32 %v3219_v21, %v3834_v33  ;;  %v3221_v30 = vpop.eup %3220 }
 0x497   :  { %v3880_v31 = vadd.f32 %v1223_v24, %v1222_v34 }
 0x499   :  { %3222 = vtanh.f32 %v3880_v31 }
 0x4a3   :  { %v3223_v45 = vpop.eup %3222 }
 0x4a4   :  { %v3883_v46 = vmul.f32 %v3223_v45, %v3221_v30 }
 0x4a6   :  { %1301 = vmatmul.mubr.f32.vlgmr.msra.gmra.mrb[8].mxu0 %v3883_v46  ;;  %1372 = vmatmul.mubr.f32.vlgmr.msra.gmra.mrb[8].mxu1 %v3883_v46 }
 0x4a7   :  { %2832 = vmatpush1.bf16.msra.mxu0 %v3581_v47  ;;  %2864 = vmatpush1.bf16.msra.mxu1 %v3584_v50 }
 0x4a8   :  { %2834 = vmatprep.subr.bf16.mxu0 %v3587_v53  ;;  %2866 = vmatprep.subr.bf16.mxu1 %v3589_v56 }
 0x4a9   :  { %1479 = vmatprep.mubr.f32.mxu0 %v3453_v0  ;;  %1550 = vmatprep.mubr.f32.mxu1 %v3453_v0 }
 0x4ab   :  { %2836 = vmatpush1.bf16.msra.mxu0 %v3592_v60  ;;  %2868 = vmatpush1.bf16.msra.mxu1 %v3596_v63 }
 0x4ac   :  { %2838 = vmatprep.subr.bf16.mxu0 %v3600_v3  ;;  %2870 = vmatprep.subr.bf16.mxu1 %v3603_v6 }
 0x4af   :  { %2840 = vmatpush1.bf16.msra.mxu0 %v3606_v10  ;;  %2872 = vmatpush1.bf16.msra.mxu1 %v3610_v13 }
 0x4b0   :  { %2842 = vmatprep.subr.bf16.mxu0 %v3614_v16  ;;  %2874 = vmatprep.subr.bf16.mxu1 %v3617_v19 }
 0x4b3   :  { %2844 = vmatpush1.bf16.msra.mxu0 %v3620_v23  ;;  %2876 = vmatpush1.bf16.msra.mxu1 %v3624_v26 }
 0x4b4   :  { %2846 = vmatprep.subr.bf16.mxu0 %v3628_v29  ;;  %2878 = vmatprep.subr.bf16.mxu1 %v3631_v32 }
 0x4b7   :  { %2848 = vmatpush1.bf16.msra.mxu0 %v3634_v36  ;;  %2880 = vmatpush1.bf16.msra.mxu1 %v3638_v40 }
 0x4b8   :  { %2850 = vmatprep.subr.bf16.mxu0 %v3642_v44  ;;  %2882 = vmatprep.subr.bf16.mxu1 %v3645_v48 }
 0x4bb   :  { %2852 = vmatpush1.bf16.msra.mxu0 %v3648_v54  ;;  %2884 = vmatpush1.bf16.msra.mxu1 %v3652_v58 }
 0x4bc   :  { %2854 = vmatprep.subr.bf16.mxu0 %v3656_v62  ;;  %2886 = vmatprep.subr.bf16.mxu1 %v3659_v4 }
 0x4bf   :  { %2856 = vmatpush1.bf16.msra.mxu0 %v3662_v9  ;;  %2888 = vmatpush1.bf16.msra.mxu1 %v3666_v14 }
 0x4c0   :  { %2858 = vmatprep.subr.bf16.mxu0 %v3670_v18  ;;  %2890 = vmatprep.subr.bf16.mxu1 %v3673_v22 }
 0x4c3   :  { %2860 = vmatpush1.bf16.msra.mxu0 %v3676_v25  ;;  %2892 = vmatpush1.bf16.msra.mxu1 %v3680_v27 }
 0x4c4   :  { %2894 = vmatprep.subr.bf16.mxu0 %v3577_v38  ;;  %2926 = vmatprep.subr.bf16.mxu1 %v3579_v41 }
 0x579   :  { %v1302_v33 = vpop.f32.mrb[8].mxu0  ;;  %v1373_v49 = vpop.f32.mrb[8].mxu1 }
 0x57a   :  { %v3093_v51 = vadd.f32 %v1302_v33, %v3730_v35  ;;  %v1304_v52 = vpop.f32.mrb[9].mxu0  ;;  %v1375_v55 = vpop.f32.mrb[9].mxu1  ;;  %v3109_v8 = vadd.f32 %v1373_v49, %v3739_v1 }
 0x57b   :  { %v3094_v59 = vadd.f32 %v1304_v52, %v3732_v37  ;;  %v3110_v5 = vadd.f32 %v1375_v55, %v3736_v57 }
 0x57c   :  { %v2295_v61 = vmul.f32 -1.442695, %v3093_v51 }
 0x57d   :  { %v2296_v2 = vmul.f32 -1.442695, %v3094_v59  ;;  %v2297_v7 = vmul.f32 -1.442695, %v3110_v5 }
 0x57e   :  { %3224 = vpow2.f32 %v2295_v61 }
 0x57f   :  { %3226 = vpow2.f32 %v2296_v2 }
 0x580   :  { %3228 = vpow2.f32 %v2297_v7 }
 0x581   :  { %3230 = vtanh.f32 %v3109_v8 }
 0x588   :  { %v3225_v11 = vpop.eup %3224 }
 0x589   :  { %v3227_v12 = vpop.eup %3226  ;;  %v1385_v15 = vadd.f32 1.0, %v3225_v11 }
 0x58a   :  { %v1391_v17 = vadd.f32 1.0, %v3227_v12  ;;  %v3229_v20 = vpop.eup %3228 }
 0x58b   :  { %3232 = vrcp.f32 %v1385_v15  ;;  %v3231_v21 = vpop.eup %3230  ;;  %v1398_v30 = vadd.f32 1.0, %v3229_v20 }
 0x58c   :  { %3234 = vrcp.f32 %v1391_v17 }
 0x58d   :  { %3236 = vrcp.f32 %v1398_v30 }
 0x595   :  { %v3233_v24 = vpop.eup %3232 }
 0x596   :  { %v3235_v28 = vpop.eup %3234  ;;  %v1402_v34 = vmul.f32 %v3233_v24, %v3231_v21 }
 0x597   :  { %v1401_v45 = vmul.f32 %v3235_v28, %v3880_v31  ;;  %v3237_v49 = vpop.eup %3236 }
 0x599   :  { %v3926_v33 = vadd.f32 %v1402_v34, %v1401_v45 }
 0x59b   :  { %3238 = vtanh.f32 %v3926_v33 }
 0x5a5   :  { %v3239_v51 = vpop.eup %3238 }
 0x5a6   :  { %v3929_v52 = vmul.f32 %v3239_v51, %v3237_v49 }
 0x5a8   :  { %1480 = vmatmul.mubr.f32.vlgmr.msra.gmra.mrb[10].mxu0 %v3929_v52  ;;  %1551 = vmatmul.mubr.f32.vlgmr.msra.gmra.mrb[10].mxu1 %v3929_v52 }
 0x5a9   :  { %2896 = vmatpush1.bf16.msra.mxu0 %v3581_v47  ;;  %2928 = vmatpush1.bf16.msra.mxu1 %v3584_v50 }
 0x5aa   :  { %2898 = vmatprep.subr.bf16.mxu0 %v3587_v53  ;;  %2930 = vmatprep.subr.bf16.mxu1 %v3589_v56 }
 0x5ab   :  { %1658 = vmatprep.mubr.f32.mxu0 %v3453_v0  ;;  %1729 = vmatprep.mubr.f32.mxu1 %v3453_v0 }
 0x5ad   :  { %2900 = vmatpush1.bf16.msra.mxu0 %v3592_v60  ;;  %2932 = vmatpush1.bf16.msra.mxu1 %v3596_v63 }
 0x5ae   :  { %2902 = vmatprep.subr.bf16.mxu0 %v3600_v3  ;;  %2934 = vmatprep.subr.bf16.mxu1 %v3603_v6 }
 0x5b1   :  { %2904 = vmatpush1.bf16.msra.mxu0 %v3606_v10  ;;  %2936 = vmatpush1.bf16.msra.mxu1 %v3610_v13 }
 0x5b2   :  { %2906 = vmatprep.subr.bf16.mxu0 %v3614_v16  ;;  %2938 = vmatprep.subr.bf16.mxu1 %v3617_v19 }
 0x5b5   :  { %2908 = vmatpush1.bf16.msra.mxu0 %v3620_v23  ;;  %2940 = vmatpush1.bf16.msra.mxu1 %v3624_v26 }
 0x5b6   :  { %2910 = vmatprep.subr.bf16.mxu0 %v3628_v29  ;;  %2942 = vmatprep.subr.bf16.mxu1 %v3631_v32 }
 0x5b9   :  { %2912 = vmatpush1.bf16.msra.mxu0 %v3634_v36  ;;  %2944 = vmatpush1.bf16.msra.mxu1 %v3638_v40 }
 0x5ba   :  { %2914 = vmatprep.subr.bf16.mxu0 %v3642_v44  ;;  %2946 = vmatprep.subr.bf16.mxu1 %v3645_v48 }
 0x5bd   :  { %2916 = vmatpush1.bf16.msra.mxu0 %v3648_v54  ;;  %2948 = vmatpush1.bf16.msra.mxu1 %v3652_v58 }
 0x5be   :  { %2918 = vmatprep.subr.bf16.mxu0 %v3656_v62  ;;  %2950 = vmatprep.subr.bf16.mxu1 %v3659_v4 }
 0x5c1   :  { %2920 = vmatpush1.bf16.msra.mxu0 %v3662_v9  ;;  %2952 = vmatpush1.bf16.msra.mxu1 %v3666_v14 }
 0x5c2   :  { %2922 = vmatprep.subr.bf16.mxu0 %v3670_v18  ;;  %2954 = vmatprep.subr.bf16.mxu1 %v3673_v22 }
 0x5c5   :  { %2924 = vmatpush1.bf16.msra.mxu0 %v3676_v25  ;;  %2956 = vmatpush1.bf16.msra.mxu1 %v3680_v27 }
 0x5c6   :  { %2958 = vmatprep.subr.bf16.mxu0 %v3577_v38  ;;  %2990 = vmatprep.subr.bf16.mxu1 %v3579_v41 }
 0x67b   :  { %v1481_v31 = vpop.f32.mrb[10].mxu0  ;;  %v1552_v55 = vpop.f32.mrb[10].mxu1 }
 0x67c   :  { %v3095_v59 = vadd.f32 %v1481_v31, %v3730_v35  ;;  %v1483_v61 = vpop.f32.mrb[11].mxu0  ;;  %v1554_v2 = vpop.f32.mrb[11].mxu1  ;;  %v3111_v15 = vadd.f32 %v1552_v55, %v3739_v1 }
 0x67d   :  { %v3096_v5 = vadd.f32 %v1483_v61, %v3732_v37  ;;  %v3112_v11 = vadd.f32 %v1554_v2, %v3736_v57  ;;  %v1957_v61 = vld [vmem:[#allocation10 + $0x20] sm:$0xff]  ;;  %v1958_v2 = vld [vmem:[#allocation10 + $0x28] sm:$0xff] }
 0x67e   :  { %v2298_v7 = vmul.f32 -1.442695, %v3095_v59 }
 0x67f   :  { %v2299_v8 = vmul.f32 -1.442695, %v3096_v5  ;;  %v2300_v12 = vmul.f32 -1.442695, %v3112_v11  ;;  %v3029_v5 = vpack.c.bf16 %v1958_v2, %v1957_v61 }
 0x680   :  { %3240 = vpow2.f32 %v2298_v7  ;;  %v1959_v7 = vld [vmem:[#allocation10 + $0x30] sm:$0xff] }
 0x681   :  { %3242 = vpow2.f32 %v2299_v8  ;;  %v1960_v8 = vld [vmem:[#allocation10 + $0x38] sm:$0xff] }
 0x682   :  { %3244 = vpow2.f32 %v2300_v12  ;;  %v3033_v11 = vpack.c.bf16 %v1960_v8, %v1959_v7  ;;  %v1961_v12 = vld [vmem:[#allocation10 + $0x40] sm:$0xff] }
 0x683   :  { %3246 = vtanh.f32 %v3111_v15  ;;  %v1962_v15 = vld [vmem:[#allocation10 + $0x48] sm:$0xff] }
 0x68a   :  { %v3241_v38 = vpop.eup %3240 }
 0x68b   :  { %v3243_v17 = vpop.eup %3242  ;;  %v1564_v41 = vadd.f32 1.0, %v3241_v38  ;;  %v3037_v38 = vpack.c.bf16 %v1962_v15, %v1961_v12 }
 0x68c   :  { %v1570_v20 = vadd.f32 1.0, %v3243_v17  ;;  %v3245_v21 = vpop.eup %3244  ;;  %v1963_v17 = vld [vmem:[#allocation10 + $0x50] sm:$0xff] }
 0x68d   :  { %3248 = vrcp.f32 %v1564_v41  ;;  %v3247_v24 = vpop.eup %3246  ;;  %v1577_v45 = vadd.f32 1.0, %v3245_v21  ;;  %v1964_v41 = vld [vmem:[#allocation10 + $0x58] sm:$0xff]  ;;  %v1965_v21 = vld [vmem:[#allocation10 + $0x60] sm:$0xff] }
 0x68e   :  { %3250 = vrcp.f32 %v1570_v20  ;;  %v3041_v20 = vpack.c.bf16 %v1964_v41, %v1963_v17 }
 0x68f   :  { %3252 = vrcp.f32 %v1577_v45  ;;  %v2121_v45 = vld [vmem:[#allocation12] sm:$0xff] }
 0x697   :  { %v3249_v28 = vpop.eup %3248 }
 0x698   :  { %v3251_v34 = vpop.eup %3250  ;;  %v1581_v30 = vmul.f32 %v3249_v28, %v3247_v24  ;;  %v1966_v24 = vld [vmem:[#allocation10 + $0x68] sm:$0xff]  ;;  %v1967_v28 = vld [vmem:[#allocation10 + $0x70] sm:$0xff] }
 0x699   :  { %v1580_v49 = vmul.f32 %v3251_v34, %v3926_v33  ;;  %v3253_v31 = vpop.eup %3252  ;;  %v1968_v34 = vld [vmem:[#allocation10 + $0x78] sm:$0xff] }
 0x69b   :  { %v3972_v51 = vadd.f32 %v1581_v30, %v1580_v49  ;;  %v3049_v30 = vpack.c.bf16 %v1968_v34, %v1967_v28  ;;  %v2122_v49 = vld [vmem:[#allocation12 + $0x8] sm:$0xff] }
 0x69d   :  { %3254 = vtanh.f32 %v3972_v51 }
 0x6a7   :  { %v3255_v55 = vpop.eup %3254 }
 0x6a8   :  { %v3975_v59 = vmul.f32 %v3255_v55, %v3253_v31  ;;  %v2123_v31 = vld [vmem:[#allocation12 + $0x10] sm:$0xff]  ;;  %v2124_v55 = vld [vmem:[#allocation12 + $0x18] sm:$0xff] }
 0x6aa   :  { %1659 = vmatmul.mubr.f32.vlgmr.msra.gmra.mrb[12].mxu0 %v3975_v59  ;;  %1730 = vmatmul.mubr.f32.vlgmr.msra.gmra.mrb[12].mxu1 %v3975_v59 }
 0x6ab   :  { %2960 = vmatpush1.bf16.msra.mxu0 %v3581_v47  ;;  %2992 = vmatpush1.bf16.msra.mxu1 %v3584_v50  ;;  %v1954_v47 = vld [vmem:[#allocation10 + $0x8] sm:$0xff] }
 0x6ac   :  { %2962 = vmatprep.subr.bf16.mxu0 %v3587_v53  ;;  %2994 = vmatprep.subr.bf16.mxu1 %v3589_v56 }
 0x6ad   :  { %1837 = vmatprep.mubr.f32.mxu0 %v3453_v0  ;;  %1908 = vmatprep.mubr.f32.mxu1 %v3453_v0  ;;  %v1953_v0 = vld [vmem:[#allocation10] sm:$0xff] }
 0x6ae   :  { %v3021_v50 = vpack.c.bf16 %v1954_v47, %v1953_v0  ;;  %v3057_v0 = vpack.c.bf16 %v2124_v55, %v2123_v31  ;;  %v2126_v47 = vld [vmem:[#allocation12 + $0x28] sm:$0xff] }
 0x6af   :  { %2964 = vmatpush1.bf16.msra.mxu0 %v3592_v60  ;;  %2996 = vmatpush1.bf16.msra.mxu1 %v3596_v63 }
 0x6b0   :  { %2966 = vmatprep.subr.bf16.mxu0 %v3600_v3  ;;  %2998 = vmatprep.subr.bf16.mxu1 %v3603_v6 }
 0x6b3   :  { %2968 = vmatpush1.bf16.msra.mxu0 %v3606_v10  ;;  %3000 = vmatpush1.bf16.msra.mxu1 %v3610_v13 }
 0x6b4   :  { %2970 = vmatprep.subr.bf16.mxu0 %v3614_v16  ;;  %3002 = vmatprep.subr.bf16.mxu1 %v3617_v19 }
 0x6b7   :  { %2972 = vmatpush1.bf16.msra.mxu0 %v3620_v23  ;;  %3004 = vmatpush1.bf16.msra.mxu1 %v3624_v26 }
 0x6b8   :  { %2974 = vmatprep.subr.bf16.mxu0 %v3628_v29  ;;  %3006 = vmatprep.subr.bf16.mxu1 %v3631_v32 }
 0x6bb   :  { %2976 = vmatpush1.bf16.msra.mxu0 %v3634_v36  ;;  %3008 = vmatpush1.bf16.msra.mxu1 %v3638_v40 }
 0x6bc   :  { %2978 = vmatprep.subr.bf16.mxu0 %v3642_v44  ;;  %3010 = vmatprep.subr.bf16.mxu1 %v3645_v48 }
 0x6bf   :  { %2980 = vmatpush1.bf16.msra.mxu0 %v3648_v54  ;;  %3012 = vmatpush1.bf16.msra.mxu1 %v3652_v58 }
 0x6c0   :  { %2982 = vmatprep.subr.bf16.mxu0 %v3656_v62  ;;  %3014 = vmatprep.subr.bf16.mxu1 %v3659_v4 }
 0x6c3   :  { %2984 = vmatpush1.bf16.msra.mxu0 %v3662_v9  ;;  %3016 = vmatpush1.bf16.msra.mxu1 %v3666_v14  ;;  %v1955_v14 = vld [vmem:[#allocation10 + $0x10] sm:$0xff] }
 0x6c4   :  { %2986 = vmatprep.subr.bf16.mxu0 %v3670_v18  ;;  %3018 = vmatprep.subr.bf16.mxu1 %v3673_v22  ;;  %v1956_v18 = vld [vmem:[#allocation10 + $0x18] sm:$0xff] }
 0x6c5   :  { %v3025_v33 = vpack.c.bf16 %v1956_v18, %v1955_v14 }
 0x6c7   :  { %2988 = vmatpush1.bf16.msra.mxu0 %v3676_v25  ;;  %3020 = vmatpush1.bf16.msra.mxu1 %v3680_v27 }
 0x6c8   :  { %3022 = vmatprep.subr.bf16.mxu0 %v3021_v50 }
 0x77d   :  { %v1660_v53 = vpop.f32.mrb[12].mxu0  ;;  %v1731_v56 = vpop.f32.mrb[12].mxu1 }
 0x77e   :  { %v3097_v60 = vadd.f32 %v1660_v53, %v3730_v35  ;;  %v1662_v63 = vpop.f32.mrb[13].mxu0  ;;  %v1733_v3 = vpop.f32.mrb[13].mxu1  ;;  %v3113_v23 = vadd.f32 %v1731_v56, %v3739_v1  ;;  %v2130_v53 = vld [vmem:[#allocation12 + $0x48] sm:$0xff] }
 0x77f   :  { %v3098_v6 = vadd.f32 %v1662_v63, %v3732_v37  ;;  %v3114_v16 = vadd.f32 %v1733_v3, %v3736_v57  ;;  %v2132_v63 = vld [vmem:[#allocation12 + $0x58] sm:$0xff] }
 0x780   :  { %v2301_v10 = vmul.f32 -1.442695, %v3097_v60  ;;  %v2131_v60 = vld [vmem:[#allocation12 + $0x50] sm:$0xff] }
 0x781   :  { %v2302_v13 = vmul.f32 -1.442695, %v3098_v6  ;;  %v2303_v19 = vmul.f32 -1.442695, %v3114_v16  ;;  %v3073_v3 = vpack.c.bf16 %v2132_v63, %v2131_v60  ;;  %v2133_v6 = vld [vmem:[#allocation12 + $0x60] sm:$0xff]  ;;  %v2135_v16 = vld [vmem:[#allocation12 + $0x70] sm:$0xff] }
 0x782   :  { %3256 = vpow2.f32 %v2301_v10  ;;  %v2134_v10 = vld [vmem:[#allocation12 + $0x68] sm:$0xff] }
 0x783   :  { %3258 = vpow2.f32 %v2302_v13  ;;  %v3077_v13 = vpack.c.bf16 %v2134_v10, %v2133_v6 }
 0x784   :  { %3260 = vpow2.f32 %v2303_v19  ;;  %v2136_v19 = vld [vmem:[#allocation12 + $0x78] sm:$0xff] }
 0x785   :  { %3262 = vtanh.f32 %v3113_v23  ;;  %v3081_v23 = vpack.c.bf16 %v2136_v19, %v2135_v16 }
 0x78c   :  { %v3257_v26 = vpop.eup %3256 }
 0x78d   :  { %v3259_v29 = vpop.eup %3258  ;;  %v1743_v32 = vadd.f32 1.0, %v3257_v26 }
 0x78e   :  { %v1749_v36 = vadd.f32 1.0, %v3259_v29  ;;  %v3261_v40 = vpop.eup %3260 }
 0x78f   :  { %3264 = vrcp.f32 %v1743_v32  ;;  %v3263_v44 = vpop.eup %3262  ;;  %v1756_v62 = vadd.f32 1.0, %v3261_v40 }
 0x790   :  { %3266 = vrcp.f32 %v1749_v36 }
 0x791   :  { %3268 = vrcp.f32 %v1756_v62 }
 0x799   :  { %v3265_v48 = vpop.eup %3264 }
 0x79a   :  { %v3267_v54 = vpop.eup %3266  ;;  %v1760_v58 = vmul.f32 %v3265_v48, %v3263_v44 }
 0x79b   :  { %v1759_v4 = vmul.f32 %v3267_v54, %v3972_v51  ;;  %v3269_v22 = vpop.eup %3268  ;;  %v3053_v51 = vpack.c.bf16 %v2122_v49, %v2121_v45 }
 0x79d   :  { %v4016_v9 = vadd.f32 %v1760_v58, %v1759_v4  ;;  %3054 = vmatprep.subr.bf16.mxu1 %v3053_v51 }
 0x79f   :  { %3270 = vtanh.f32 %v4016_v9 }
 0x7a9   :  { %v3271_v25 = vpop.eup %3270 }
 0x7aa   :  { %v1763_v27 = vmul.f32 %v3271_v25, %v3269_v22 }
 0x7ac   :  { %1838 = vmatmul.mubr.f32.vlgmr.msra.gmra.mrb[14].mxu0 %v1763_v27  ;;  %1909 = vmatmul.mubr.f32.vlgmr.msra.gmra.mrb[14].mxu1 %v1763_v27 }
 0x7ad   :  { %3024 = vmatpush3.bf16.msra.mxu0 %v3021_v50  ;;  %2389 = vmatprep.mubr.f32.mxu0 %v3745_v39  ;;  %v3045_v39 = vpack.c.bf16 %v1966_v24, %v1965_v21 }
 0x7ae   :  { %3026 = vmatprep.subr.bf16.mxu0 %v3025_v33  ;;  %3056 = vmatpush3.bf16.msra.mxu1 %v3053_v51 }
 0x7af   :  { %3058 = vmatprep.subr.bf16.mxu1 %v3057_v0 }
 0x7b1   :  { %3028 = vmatpush3.bf16.msra.mxu0 %v3025_v33 }
 0x7b2   :  { %3030 = vmatprep.subr.bf16.mxu0 %v3029_v5  ;;  %3060 = vmatpush3.bf16.msra.mxu1 %v3057_v0 }
 0x7b5   :  { %3032 = vmatpush3.bf16.msra.mxu0 %v3029_v5 }
 0x7b6   :  { %3034 = vmatprep.subr.bf16.mxu0 %v3033_v11 }
 0x7b9   :  { %3036 = vmatpush3.bf16.msra.mxu0 %v3033_v11 }
 0x7ba   :  { %3038 = vmatprep.subr.bf16.mxu0 %v3037_v38 }
 0x7bd   :  { %3040 = vmatpush3.bf16.msra.mxu0 %v3037_v38 }
 0x7be   :  { %3042 = vmatprep.subr.bf16.mxu0 %v3041_v20 }
 0x7c1   :  { %3044 = vmatpush3.bf16.msra.mxu0 %v3041_v20 }
 0x7c2   :  { %3046 = vmatprep.subr.bf16.mxu0 %v3045_v39 }
 0x7c5   :  { %3048 = vmatpush3.bf16.msra.mxu0 %v3045_v39 }
 0x7c6   :  { %3050 = vmatprep.subr.bf16.mxu0 %v3049_v30 }
 0x7c9   :  { %3052 = vmatpush3.bf16.msra.mxu0 %v3049_v30 }
 0x7cc   :  { %2390 = vmatmul.mubr.f32.vlgmr.msra.gmra.mrb[16].mxu0 %v3791_v42  ;;  %v2125_v42 = vld [vmem:[#allocation12 + $0x20] sm:$0xff] }
 0x7cd   :  { %2392 = vmatprep.mubr.f32.mxu0 %v3837_v43  ;;  %v3061_v43 = vpack.c.bf16 %v2126_v47, %v2125_v42 }
 0x7cf   :  { %3062 = vmatprep.subr.bf16.mxu1 %v3061_v43 }
 0x7d0   :  { %2393 = vmatmul.mubr.f32.gmra.mrb[18].mxu0 %v3883_v46  ;;  %3064 = vmatpush3.bf16.msra.mxu1 %v3061_v43  ;;  %v2127_v46 = vld [vmem:[#allocation12 + $0x30] sm:$0xff] }
 0x7d1   :  { %2395 = vmatprep.mubr.f32.mxu0 %v3929_v52  ;;  %v2128_v52 = vld [vmem:[#allocation12 + $0x38] sm:$0xff] }
 0x7d2   :  { %v3065_v50 = vpack.c.bf16 %v2128_v52, %v2127_v46 }
 0x7d4   :  { %2396 = vmatmul.mubr.f32.gmra.mrb[20].mxu0 %v3975_v59  ;;  %3066 = vmatprep.subr.bf16.mxu1 %v3065_v50  ;;  %v2129_v59 = vld [vmem:[#allocation12 + $0x40] sm:$0xff] }
 0x7d5   :  { %2398 = vmatprep.mubr.f32.mxu0 %v1763_v27  ;;  %3068 = vmatpush3.bf16.msra.mxu1 %v3065_v50  ;;  %v3069_v56 = vpack.c.bf16 %v2130_v53, %v2129_v59 }
 0x7d7   :  { %3070 = vmatprep.subr.bf16.mxu1 %v3069_v56 }
 0x7d9   :  { %3072 = vmatpush3.bf16.msra.mxu1 %v3069_v56 }
 0x7da   :  { %3074 = vmatprep.subr.bf16.mxu1 %v3073_v3 }
 0x7dd   :  { %3076 = vmatpush3.bf16.msra.mxu1 %v3073_v3 }
 0x7de   :  { %3078 = vmatprep.subr.bf16.mxu1 %v3077_v13 }
 0x7e1   :  { %3080 = vmatpush3.bf16.msra.mxu1 %v3077_v13 }
 0x7e2   :  { %3082 = vmatprep.subr.bf16.mxu1 %v3081_v23 }
 0x7e5   :  { %3084 = vmatpush3.bf16.msra.mxu1 %v3081_v23 }
 0x87f   :  { %v1839_v26 = vpop.f32.mrb[14].mxu0  ;;  %v1910_v29 = vpop.f32.mrb[14].mxu1 }
 0x880   :  { %v3099_v32 = vadd.f32 %v1839_v26, %v3730_v35  ;;  %v1841_v36 = vpop.f32.mrb[15].mxu0  ;;  %v1912_v40 = vpop.f32.mrb[15].mxu1  ;;  %v3115_v4 = vadd.f32 %v1910_v29, %v3739_v1 }
 0x881   :  { %v3100_v44 = vadd.f32 %v1841_v36, %v3732_v37  ;;  %v3116_v58 = vadd.f32 %v1912_v40, %v3736_v57  ;;  %v4033_v57 = vld [vmem:[%s4066_s5] ss:$0 sm:$0xff] }
 0x882   :  { %v2304_v48 = vmul.f32 -1.442695, %v3099_v32 }
 0x883   :  { %v2305_v54 = vmul.f32 -1.442695, %v3100_v44  ;;  %v2306_v62 = vmul.f32 -1.442695, %v3116_v58 }
 0x884   :  { %3272 = vpow2.f32 %v2304_v48 }
 0x885   :  { %3274 = vpow2.f32 %v2305_v54 }
 0x886   :  { %3276 = vpow2.f32 %v2306_v62 }
 0x887   :  { %3278 = vtanh.f32 %v3115_v4 }
 0x88e   :  { %v3273_v14 = vpop.eup %3272 }
 0x88f   :  { %v3275_v18 = vpop.eup %3274  ;;  %v1922_v22 = vadd.f32 1.0, %v3273_v14  ;;  %v2308_v14 = vld [vmem:[%s4068_s7] ss:$0 sm:$0xff]  ;;  %s3454_s7 = smov [#allocation13]  }
 0x890   :  { %v1928_v25 = vadd.f32 1.0, %v3275_v18  ;;  %v3277_v35 = vpop.eup %3276  ;;  %s2262_s27 = sshll.u32 %s3454_s7, 4  ;;  %s2263_s27 = int_to_ptr.vmem [resolvable:$true] %s2262_s27 }
 0x891   :  { %3280 = vrcp.f32 %v1922_v22  ;;  %v3279_v27 = vpop.eup %3278  ;;  %v1935_v2 = vadd.f32 1.0, %v3277_v35  ;;  %s3414_s29 = scalar_lea.vmem %s2263_s27, 1024  ;;  %p3419_p13 = scmp.lt.s32.totalorder %s2263_s27, %s2263_s27 }
 0x892   :  { %3282 = vrcp.f32 %v1928_v25  ;;  %p3415_p12 = scmp.ne.s32.totalorder %s2263_s27, %s3414_s29  ;;  %p3420_p0 = scmp.lt.s32.totalorder %s3414_s29, %s3414_s29 }
 0x893   :  { %3284 = vrcp.f32 %v1935_v2 }
 0x894   :  { %p3421_p1 = por %p3420_p0, %p3419_p13 }
 0x896   :  { %p3422_p2 = pnand %p3421_p1, %p3415_p12 }
 0x89b   :  { %v3281_v37 = vpop.eup %3280 }
 0x89c   :  { %v3283_v33 = vpop.eup %3282  ;;  %v1939_v61 = vmul.f32 %v3281_v37, %v3279_v27 }
 0x89d   :  { %v1938_v5 = vmul.f32 %v3283_v33, %v4016_v9  ;;  %v3285_v45 = vpop.eup %3284 }
 0x89f   :  { %v2391_v1 = vpop.f32.mrb[16].mxu0  ;;  %v1940_v7 = vadd.f32 %v1939_v61, %v1938_v5 }
 0x8a0   :  { %v2048_v8 = vadd.f32 %v2391_v1, %v4033_v57  ;;  %v2042_v11 = vpop.f32.mrb[17].mxu0 }
 0x8a1   :  { %v2043_v12 = vadd.f32 %v4033_v57, %v2042_v11  ;;  %3286 = vtanh.f32 %v1940_v7 }
 0x8a2   :  { %v2090_v15 = vmul.f32 0.70710677, %v2048_v8  ;;  %v2082_v52 = vmul.f32 0.5, %v2048_v8 }
 0x8a3   :  { %v2089_v38 = vmul.f32 0.70710677, %v2043_v12  ;;  %v2394_v17 = vpop.f32.mrb[18].mxu0  ;;  %v2081_v43 = vmul.f32 0.5, %v2043_v12 }
 0x8a4   :  { %3288 = verf.f32 %v2090_v15  ;;  %v2058_v9 = vadd.f32 %v2394_v17, %v4033_v57  ;;  %v2052_v41 = vpop.f32.mrb[19].mxu0 }
 0x8a5   :  { %3290 = verf.f32 %v2089_v38  ;;  %v2053_v20 = vadd.f32 %v4033_v57, %v2052_v41 }
 0x8a6   :  { %v2092_v21 = vmul.f32 0.70710677, %v2058_v9  ;;  %v2084_v6 = vmul.f32 0.5, %v2058_v9 }
 0x8a7   :  { %v2091_v24 = vmul.f32 0.70710677, %v2053_v20  ;;  %v2397_v39 = vpop.f32.mrb[20].mxu0  ;;  %v2083_v63 = vmul.f32 0.5, %v2053_v20 }
 0x8a8   :  { %3292 = verf.f32 %v2092_v21  ;;  %v2068_v28 = vadd.f32 %v2397_v39, %v4033_v57  ;;  %v2062_v34 = vpop.f32.mrb[21].mxu0 }
 0x8a9   :  { %3294 = verf.f32 %v2091_v24  ;;  %v2063_v30 = vadd.f32 %v4033_v57, %v2062_v34 }
 0x8aa   :  { %v2094_v49 = vmul.f32 0.70710677, %v2068_v28  ;;  %v2086_v32 = vmul.f32 0.5, %v2068_v28 }
 0x8ab   :  { %v3287_v51 = vpop.eup %3286  ;;  %v2093_v31 = vmul.f32 0.70710677, %v2063_v30  ;;  %v2085_v26 = vmul.f32 0.5, %v2063_v30 }
 0x8ac   :  { %3296 = verf.f32 %v2094_v49  ;;  %v1942_v55 = vmul.f32 %v3287_v51, %v3285_v45 }
 0x8ad   :  { %3298 = verf.f32 %v2093_v31 }
 0x8ae   :  { %v3289_v0 = vpop.eup %3288  ;;  %2399 = vmatmul.mubr.f32.gmra.mrb[22].mxu0 %v1942_v55 }
 0x8af   :  { %v3291_v42 = vpop.eup %3290  ;;  %v2106_v47 = vadd.f32 1.0, %v3289_v0 }
 0x8b0   :  { %v2105_v46 = vadd.f32 1.0, %v3291_v42 }
 0x8b1   :  { %v2114_v56 = vmul.f32 %v2106_v47, %v2082_v52 }
 0x8b2   :  { %v3293_v50 = vpop.eup %3292  ;;  %v2113_v59 = vmul.f32 %v2105_v46, %v2081_v43 }
 0x8b3   :  { %v3295_v53 = vpop.eup %3294  ;;  %v2108_v60 = vadd.f32 1.0, %v3293_v50 }
 0x8b4   :  { %v2107_v3 = vadd.f32 1.0, %v3295_v53  ;;  %2433 = vmatprep.mubr.f32.mxu1 %v2113_v59 }
 0x8b5   :  { %2434 = vmatmul.mubr.f32.vlgmr.msra.gmra.mrb[16].mxu1 %v2114_v56  ;;  %v2116_v23 = vmul.f32 %v2108_v60, %v2084_v6 }
 0x8b6   :  { %v3297_v10 = vpop.eup %3296  ;;  %v2115_v13 = vmul.f32 %v2107_v3, %v2083_v63 }
 0x8b7   :  { %v3299_v16 = vpop.eup %3298  ;;  %v2110_v19 = vadd.f32 1.0, %v3297_v10 }
 0x8b8   :  { %v2109_v29 = vadd.f32 1.0, %v3299_v16  ;;  %2436 = vmatprep.mubr.f32.mxu1 %v2115_v13 }
 0x8b9   :  { %2437 = vmatmul.mubr.f32.gmra.mrb[18].mxu1 %v2116_v23  ;;  %v2118_v40 = vmul.f32 %v2110_v19, %v2086_v32 }
 0x8ba   :  { %v2117_v36 = vmul.f32 %v2109_v29, %v2085_v26 }
 0x8bc   :  { %2439 = vmatprep.mubr.f32.mxu1 %v2117_v36 }
 0x8bd   :  { %2440 = vmatmul.mubr.f32.gmra.mrb[20].mxu1 %v2118_v40 }
 0x981   :  { %v2400_v44 = vpop.f32.mrb[22].mxu0 }
 0x982   :  { %v2078_v48 = vadd.f32 %v2400_v44, %v4033_v57  ;;  %v2072_v54 = vpop.f32.mrb[23].mxu0 }
 0x983   :  { %v2073_v58 = vadd.f32 %v4033_v57, %v2072_v54 }
 0x984   :  { %v2096_v62 = vmul.f32 0.70710677, %v2078_v48  ;;  %v2088_v38 = vmul.f32 0.5, %v2078_v48 }
 0x985   :  { %v2095_v4 = vmul.f32 0.70710677, %v2073_v58  ;;  %v2087_v11 = vmul.f32 0.5, %v2073_v58 }
 0x986   :  { %3300 = verf.f32 %v2096_v62 }
 0x987   :  { %3302 = verf.f32 %v2095_v4 }
 0x988   :  { %v2435_v18 = vpop.f32.mrb[16].mxu1 }
 0x989   :  { %v2216_v22 = vadd.f32 %v2435_v18, %v2308_v14  ;;  %v2210_v25 = vpop.f32.mrb[17].mxu1 }
 0x98a   :  { %v2211_v35 = vadd.f32 %v2308_v14, %v2210_v25 }
 0x98b   :  { %2250 = vst [vmem:[#allocation13 + $0x8] sm:$0xff] %v2216_v22 }
 0x98c   :  { %2249 = vst [vmem:[#allocation13] sm:$0xff] %v2211_v35  ;;  %v2438_v27 = vpop.f32.mrb[18].mxu1 }
 0x98d   :  { %v2226_v37 = vadd.f32 %v2438_v27, %v2308_v14  ;;  %v2220_v33 = vpop.f32.mrb[19].mxu1 }
 0x98e   :  { %v2221_v61 = vadd.f32 %v2308_v14, %v2220_v33 }
 0x98f   :  { %2252 = vst [vmem:[#allocation13 + $0x18] sm:$0xff] %v2226_v37 }
 0x990   :  { %v3301_v2 = vpop.eup %3300  ;;  %2251 = vst [vmem:[#allocation13 + $0x10] sm:$0xff] %v2221_v61  ;;  %v2441_v5 = vpop.f32.mrb[20].mxu1 }
 0x991   :  { %v3303_v57 = vpop.eup %3302  ;;  %v2112_v1 = vadd.f32 1.0, %v3301_v2  ;;  %v2236_v7 = vadd.f32 %v2441_v5, %v2308_v14  ;;  %v2230_v8 = vpop.f32.mrb[21].mxu1 }
 0x992   :  { %v2111_v12 = vadd.f32 1.0, %v3303_v57  ;;  %v2231_v15 = vadd.f32 %v2308_v14, %v2230_v8 }
 0x993   :  { %2254 = vst [vmem:[#allocation13 + $0x28] sm:$0xff] %v2236_v7  ;;  %v2120_v9 = vmul.f32 %v2112_v1, %v2088_v38 }
 0x994   :  { %2253 = vst [vmem:[#allocation13 + $0x20] sm:$0xff] %v2231_v15  ;;  %v2119_v17 = vmul.f32 %v2111_v12, %v2087_v11 }
 0x996   :  { %2442 = vmatprep.mubr.f32.mxu1 %v2119_v17 }
 0x997   :  { %2443 = vmatmul.mubr.f32.gmra.mrb[22].mxu1 %v2120_v9 }
 0xa6a   :  { %v2444_v41 = vpop.f32.mrb[22].mxu1 }
 0xa6b   :  { %v2246_v20 = vadd.f32 %v2444_v41, %v2308_v14  ;;  %v2240_v21 = vpop.f32.mrb[23].mxu1 }
 0xa6c   :  { %v2241_v24 = vadd.f32 %v2308_v14, %v2240_v21 }
 0xa6d   :  { %2256 = vst [vmem:[#allocation13 + $0x38] sm:$0xff] %v2246_v20 }
 0xa6e   :  { %2255 = vst [vmem:[#allocation13 + $0x30] sm:$0xff] %v2241_v24 }
 0xa6f   :  { %3425 = shalt.err (!%p3422_p2)
}
 0xa70   :  { %s3426_s10 = scalar_lea.hbm %s4069_s8, 1024 }
 0xa71   :  { %p3427_p3 = scmp.ne.s32.totalorder %s4069_s8, %s3426_s10  ;;  %p3430_p4 = scmp.lt.u32.totalorder %s3426_s10, %s4069_s8 }
 0xa73   :  { %p3432_p5 = pnand %p3430_p4, %p3427_p3 }
 0xa75   :  { %3435 = shalt.err (!%p3432_p5)
}
 0xa76   :  { %2268 = dma.vmem_to_hbm [thread:$0]  %s2263_s27, 1024, %s4069_s8, [#allocation6], %s3449_s28, %s3449_s28, %s3450_s9  }
 0xa77   :  { %3442 = dma.done.wait [#allocation6], 1024  }
 0xa78   :  { %3443 = vsyncadd [#allocation6], 4294966272 }
 0xa79   :  { %2272 = vsyncpa [#allocation5], 1 }
 0xa7a   :  { %2273 = vsyncpa [#allocation8], 1 }
 0xa7b   :  { %2274 = vsyncpa [#allocation11], 1 }
 0xa7c   :  { %2275 = vsyncpa [#allocation6], 1 }

</bundles_post_ra>
